<compile_context>
chip_gen: v7x
topology: tpu7x:2x2x1
jax: 0.10.0
libtpu: 0.0.40
codegen_flags: <defaults>
</compile_context>

<pallas_src>
import functools
import math

import jax
import jax.numpy as jnp
from jax.experimental import pallas as pl
from jax.experimental.pallas import tpu as pltpu


K = 5              # conv kernel size
PAD = K // 2       # 'same' padding
C1 = 32            # conv stage-1 channels
C2 = 64            # conv stage-2 channels (== CNN attention hidden)
NH = 4             # attention heads
HD = C2 // NH      # head dim
LSTM_H = 32        # LSTM hidden size
OUT_LANES = 128    # lane-dense logits width (sliced to num_classes on host)


# -----------------------------------------------------------------------------
# Packed-slab layout: every parameter lives at a static (row_offset, rows, cols)
# inside one (total_rows, 192) f32 array.  Offsets are 8-row aligned.
# -----------------------------------------------------------------------------
def _slab_layout(num_features, window_size, stat_dim):
    L2 = window_size // 4
    h4 = 4 * LSTM_H
    entries = [
        ("conv1_w", K * num_features, C1),
        ("conv1_b", 1, C1),
        ("conv2_w", K * C1, C2),
        ("conv2_b", 1, C2),
        ("attn_wqkv", C2, 3 * C2),
        ("attn_bqkv", 1, 3 * C2),
        ("attn_wo", C2, C2),
        ("attn_bo", 1, C2),
        ("lstm_wih1_cnn", L2 * C2, h4),
        ("lstm_wih1_stat", stat_dim, h4),
        ("lstm_b1", 1, h4),
        ("lstm_wih2", LSTM_H, h4),
        ("lstm_b2", 1, h4),
        ("attn2_wvo", LSTM_H, LSTM_H),
        ("attn2_bvo", 1, LSTM_H),
        ("cls_w1", LSTM_H, LSTM_H // 2),
        ("cls_b1", 1, LSTM_H // 2),
        ("cls_w2", LSTM_H // 2, OUT_LANES),
        ("cls_b2", 1, OUT_LANES),
    ]
    layout, off, width = {}, 0, 0
    for name, rows, cols in entries:
        layout[name] = (off, rows, cols)
        off += -(-rows // 8) * 8            # 8-sublane aligned start for next block
        width = max(width, cols)
    return layout, off, width


def pack_params(params, layout, total_rows, width):
    slab = jnp.zeros((total_rows, width), jnp.float32)
    for name, (off, rows, cols) in layout.items():
        w = jnp.asarray(params[name], jnp.float32)
        assert w.shape == (rows, cols), (name, w.shape, (rows, cols))
        slab = slab.at[off:off + rows, :cols].set(w)
    return slab


# -----------------------------------------------------------------------------
# The single fused forward kernel (closure over the static slab layout).
# -----------------------------------------------------------------------------
def _make_kernel(layout, B, W, F, stat_dim):
    L1, L2 = W // 2, W // 4
    f32 = jnp.float32
    h4 = 4 * LSTM_H

    def ld(slab, name):                      # static slab slice -> loaded value
        r0, nr, nc = layout[name]
        return slab[r0:r0 + nr, 0:nc]

    def kernel(x_ref, stat_ref, slab_ref, o_ref,
               pad1_ref, y1_ref, pad2_ref, y2_ref):
        # ---------- Conv1 (K accumulated dots) + folded BN + ReLU ------------
        pad1_ref[...] = jnp.zeros_like(pad1_ref)
        pad1_ref[:, PAD:PAD + W, :] = x_ref[...]
        w1_off = layout["conv1_w"][0]
        acc1 = jnp.zeros((B * W, C1), f32)
        for k in range(K):
            win = pad1_ref[:, k:k + W, :].reshape(B * W, F)
            wk = slab_ref[w1_off + k * F:w1_off + (k + 1) * F, 0:C1]
            acc1 = acc1 + jnp.dot(win, wk, preferred_element_type=f32)
        y1_ref[...] = jnp.maximum(acc1 + ld(slab_ref, "conv1_b"), 0.0)

        # ---------- MaxPool1d(2,2): stride-2 sublane reads -------------------
        p1 = jnp.maximum(y1_ref[pl.ds(0, B * L1, stride=2), :],
                         y1_ref[pl.ds(1, B * L1, stride=2), :])      # (B*L1, C1)

        # ---------- Conv2 (K accumulated dots) + folded BN + ReLU ------------
        pad2_ref[...] = jnp.zeros_like(pad2_ref)
        pad2_ref[:, PAD:PAD + L1, :] = p1.reshape(B, L1, C1)
        w2_off = layout["conv2_w"][0]
        acc2 = jnp.zeros((B * L1, C2), f32)
        for k in range(K):
            win = pad2_ref[:, k:k + L1, :].reshape(B * L1, C1)
            wk = slab_ref[w2_off + k * C1:w2_off + (k + 1) * C1, 0:C2]
            acc2 = acc2 + jnp.dot(win, wk, preferred_element_type=f32)
        y2_ref[...] = jnp.maximum(acc2 + ld(slab_ref, "conv2_b"), 0.0)

        # ---------- MaxPool1d(2,2) -------------------------------------------
        p2 = jnp.maximum(y2_ref[pl.ds(0, B * L2, stride=2), :],
                         y2_ref[pl.ds(1, B * L2, stride=2), :])      # (B*L2, C2)

        # ---------- Temporal attention over the L2 sequence (+ residual) -----
        # 1/sqrt(head_dim) is pre-folded into Wq/bq on the host.
        qkv = (jnp.dot(p2, ld(slab_ref, "attn_wqkv"), preferred_element_type=f32)
               + ld(slab_ref, "attn_bqkv"))                          # (B*L2, 3*C2)
        q3 = qkv[:, 0:C2].reshape(B, L2, C2)
        k3 = qkv[:, C2:2 * C2].reshape(B, L2, C2)
        v3 = qkv[:, 2 * C2:3 * C2].reshape(B, L2, C2)
        wo_off = layout["attn_wo"][0]
        ctx = jnp.zeros((B * L2, C2), f32)
        for h in range(NH):                  # static head loop (tiny shapes)
            hs = slice(h * HD, (h + 1) * HD)
            s = jnp.einsum("bqd,bkd->bqk", q3[:, :, hs], k3[:, :, hs],
                           preferred_element_type=f32)               # (B, L2, L2)
            s = s - jnp.max(s, axis=-1, keepdims=True)
            e = jnp.exp(s)
            a = e * pl.reciprocal(jnp.sum(e, axis=-1, keepdims=True), approx=True)
            ah = jnp.einsum("bqk,bkd->bqd", a, v3[:, :, hs],
                            preferred_element_type=f32)              # (B, L2, HD)
            ctx = ctx + jnp.dot(ah.reshape(B * L2, HD),
                                slab_ref[wo_off + h * HD:wo_off + (h + 1) * HD, 0:C2],
                                preferred_element_type=f32)
        attn = ctx + ld(slab_ref, "attn_bo") + p2                    # (B*L2, C2)

        # ---------- flatten (channel-major handled by host row-permutation)
        #            + concat([cnn_flat, stat]) folded into LSTM-1 matmuls ----
        attn3 = attn.reshape(B, L2, C2)
        w1c_off = layout["lstm_wih1_cnn"][0]
        gates1 = (jnp.dot(stat_ref[...], ld(slab_ref, "lstm_wih1_stat"),
                          preferred_element_type=f32) + ld(slab_ref, "lstm_b1"))
        for l in range(L2):
            gates1 = gates1 + jnp.dot(
                attn3[:, l, :],
                slab_ref[w1c_off + l * C2:w1c_off + (l + 1) * C2, 0:h4],
                preferred_element_type=f32)                          # (B, 4H)

        # ---------- 2-layer LSTM, seq_len = 1, zero initial state ------------
        def lstm_cell(g):
            i = jax.nn.sigmoid(g[:, 0:LSTM_H])
            c = jnp.tanh(g[:, 2 * LSTM_H:3 * LSTM_H])  # forget gate * c0 == 0
            o = jax.nn.sigmoid(g[:, 3 * LSTM_H:4 * LSTM_H])
            return o * jnp.tanh(i * c)

        h1 = lstm_cell(gates1)                       # inter-layer dropout: eval id
        gates2 = (jnp.dot(h1, ld(slab_ref, "lstm_wih2"), preferred_element_type=f32)
                  + ld(slab_ref, "lstm_b2"))
        h2 = lstm_cell(gates2)                                       # (B, LSTM_H)

        # ---------- S=1 attention folded to one affine + residual ------------
        a2 = (jnp.dot(h2, ld(slab_ref, "attn2_wvo"), preferred_element_type=f32)
              + ld(slab_ref, "attn2_bvo") + h2)

        # ---------- classifier MLP; lane-dense (B, 128) logits store ---------
        z = jnp.maximum(jnp.dot(a2, ld(slab_ref, "cls_w1"),
                                preferred_element_type=f32)
                        + ld(slab_ref, "cls_b1"), 0.0)
        o_ref[...] = (jnp.dot(z, ld(slab_ref, "cls_w2"), preferred_element_type=f32)
                      + ld(slab_ref, "cls_b2"))

    return kernel


# -----------------------------------------------------------------------------
# Host wrapper: one pallas_call for the whole forward.
# -----------------------------------------------------------------------------
def cnn_lstm_forward(slab, window_batch, stat_batch, *, num_classes):
    B, W, F = window_batch.shape
    stat_dim = stat_batch.shape[-1]
    assert W % 4 == 0, "window_size must be divisible by 4 (two pool-by-2 stages)"
    L1, L2 = W // 2, W // 4
    layout, rows, width = _slab_layout(F, W, stat_dim)
    assert slab.shape == (rows, width), (slab.shape, (rows, width))

    h4 = 4 * LSTM_H
    flops = 2 * (B * W * K * F * C1 + B * L1 * K * C1 * C2
                 + B * L2 * C2 * 3 * C2
                 + NH * (2 * B * L2 * L2 * HD + B * L2 * HD * C2)
                 + B * (L2 * C2 + stat_dim) * h4 + B * LSTM_H * h4
                 + B * LSTM_H * LSTM_H + B * LSTM_H * (LSTM_H // 2)
                 + B * (LSTM_H // 2) * OUT_LANES)
    transcendentals = B * NH * L2 * L2 + 8 * B * LSTM_H
    bytes_accessed = 4 * (window_batch.size + stat_batch.size
                          + slab.size + B * OUT_LANES)

    out = pl.pallas_call(
        _make_kernel(layout, B, W, F, stat_dim),
        out_shape=jax.ShapeDtypeStruct((B, OUT_LANES), jnp.float32),
        scratch_shapes=[
            pltpu.VMEM((B, W + 2 * PAD, F), jnp.float32),    # conv1 padded input
            pltpu.VMEM((B * W, C1), jnp.float32),            # conv1 ReLU out (pool src)
            pltpu.VMEM((B, L1 + 2 * PAD, C1), jnp.float32),  # conv2 padded input
            pltpu.VMEM((B * L1, C2), jnp.float32),           # conv2 ReLU out (pool src)
        ],
        cost_estimate=pl.CostEstimate(flops=flops,
                                      transcendentals=transcendentals,
                                      bytes_accessed=bytes_accessed),
    )(window_batch, stat_batch, slab)
    return out[:, :num_classes]


# -----------------------------------------------------------------------------
# Parameter init (deterministic, synthetic) with all host-side folds applied.
# -----------------------------------------------------------------------------
def init_params(key, num_features, window_size, stat_dim, num_classes):
    keys = iter(jax.random.split(key, 64))

    def nrm(shape, s=0.1):
        return jax.random.normal(next(keys), shape, jnp.float32) * s

    eps = 1e-5
    L2 = window_size // 4
    H = LSTM_H
    p = {}

    def conv_bn_fold(cin, cout):
        # torch Conv1d weight is (cout, cin, k); a real checkpoint converts it to
        # (k, cin, cout) once.  Eval-mode BatchNorm is folded into weight & bias.
        w = nrm((K, cin, cout))
        b = nrm((1, cout))
        gamma = 1.0 + nrm((1, cout), 0.05)
        beta = nrm((1, cout), 0.05)
        mean = nrm((1, cout), 0.05)
        var = 1.0 + jnp.abs(nrm((1, cout), 0.2))
        s = gamma / jnp.sqrt(var + eps)
        return (w * s).reshape(K * cin, cout), b * s + (beta - mean * s)

    p["conv1_w"], p["conv1_b"] = conv_bn_fold(num_features, C1)
    p["conv2_w"], p["conv2_b"] = conv_bn_fold(C1, C2)

    # CNN temporal attention: fused (Wq|Wk|Wv), 1/sqrt(head_dim) folded into Wq/bq.
    scale = 1.0 / math.sqrt(HD)
    wq, wk, wv, wo = nrm((C2, C2)), nrm((C2, C2)), nrm((C2, C2)), nrm((C2, C2))
    bq, bk, bv, bo = nrm((1, C2)), nrm((1, C2)), nrm((1, C2)), nrm((1, C2))
    p["attn_wqkv"] = jnp.concatenate([wq * scale, wk, wv], axis=1)   # (64, 192)
    p["attn_bqkv"] = jnp.concatenate([bq * scale, bk, bv], axis=1)   # (1, 192)
    p["attn_wo"], p["attn_bo"] = wo, bo

    # LSTM layer 1: input = [Flatten(B, C2, L2) ; stat].  torch flattens
    # channel-major (row c*L2 + l); the kernel consumes per-timestep blocks
    # (row l*C2 + c), so permute rows once at conversion time.
    cnn_dim = C2 * L2
    wih1_torch = nrm((cnn_dim, 4 * H))
    p["lstm_wih1_cnn"] = (wih1_torch.reshape(C2, L2, 4 * H)
                          .transpose(1, 0, 2).reshape(L2 * C2, 4 * H))
    p["lstm_wih1_stat"] = nrm((stat_dim, 4 * H))
    p["lstm_b1"] = nrm((1, 4 * H)) + nrm((1, 4 * H))   # b_ih + b_hh (h0 = 0)
    p["lstm_wih2"] = nrm((H, 4 * H))
    p["lstm_b2"] = nrm((1, 4 * H)) + nrm((1, 4 * H))

    # LSTM-output TemporalAttention at seq_len == 1: softmax == 1, Q/K are dead;
    # exactly  out = h @ (Wv Wo) + (bv Wo + bo) + h.  Folded on host.
    wv2, wo2 = nrm((H, H)), nrm((H, H))
    bv2, bo2 = nrm((1, H)), nrm((1, H))
    p["attn2_wvo"] = wv2 @ wo2
    p["attn2_bvo"] = bv2 @ wo2 + bo2

    # classifier head; final layer zero-padded to OUT_LANES for a lane-dense store.
    p["cls_w1"] = nrm((H, H // 2))
    p["cls_b1"] = nrm((1, H // 2))
    w2 = nrm((H // 2, num_classes))
    b2 = nrm((1, num_classes))
    p["cls_w2"] = jnp.zeros((H // 2, OUT_LANES), jnp.float32).at[:, :num_classes].set(w2)
    p["cls_b2"] = jnp.zeros((1, OUT_LANES), jnp.float32).at[:, :num_classes].set(b2)
    return p


# -----------------------------------------------------------------------------
# Pure-jnp reference of the same folded math (numerical check of the kernel).
# -----------------------------------------------------------------------------
def reference_forward(p, x, stat, num_classes):
    B, W, F = x.shape
    L1, L2 = W // 2, W // 4
    xp = jnp.pad(x, ((0, 0), (PAD, PAD), (0, 0)))
    w1 = p["conv1_w"].reshape(K, F, C1)
    y1 = sum(jnp.einsum("btc,co->bto", xp[:, k:k + W, :], w1[k]) for k in range(K))
    y1 = jnp.maximum(y1 + p["conv1_b"], 0.0)
    p1 = jnp.maximum(y1[:, 0::2, :], y1[:, 1::2, :])
    pp = jnp.pad(p1, ((0, 0), (PAD, PAD), (0, 0)))
    w2 = p["conv2_w"].reshape(K, C1, C2)
    y2 = sum(jnp.einsum("btc,co->bto", pp[:, k:k + L1, :], w2[k]) for k in range(K))
    y2 = jnp.maximum(y2 + p["conv2_b"], 0.0)
    p2 = jnp.maximum(y2[:, 0::2, :], y2[:, 1::2, :])                 # (B, L2, C2)

    qkv = jnp.einsum("blc,cd->bld", p2, p["attn_wqkv"]) + p["attn_bqkv"]
    q = qkv[..., 0:C2].reshape(B, L2, NH, HD).transpose(0, 2, 1, 3)
    kk = qkv[..., C2:2 * C2].reshape(B, L2, NH, HD).transpose(0, 2, 1, 3)
    v = qkv[..., 2 * C2:3 * C2].reshape(B, L2, NH, HD).transpose(0, 2, 1, 3)
    s = jnp.einsum("bhqd,bhkd->bhqk", q, kk)          # 1/sqrt(HD) already in Wq
    a = jax.nn.softmax(s, axis=-1)
    ctx = jnp.einsum("bhqk,bhkd->bhqd", a, v).transpose(0, 2, 1, 3).reshape(B, L2, C2)
    attn = jnp.einsum("blc,cd->bld", ctx, p["attn_wo"]) + p["attn_bo"] + p2

    gates1 = (attn.reshape(B, L2 * C2) @ p["lstm_wih1_cnn"]
              + stat @ p["lstm_wih1_stat"] + p["lstm_b1"])

    def cell(g):
        i = jax.nn.sigmoid(g[:, 0:LSTM_H])
        c = jnp.tanh(g[:, 2 * LSTM_H:3 * LSTM_H])
        o = jax.nn.sigmoid(g[:, 3 * LSTM_H:4 * LSTM_H])
        return o * jnp.tanh(i * c)

    h1 = cell(gates1)
    h2 = cell(h1 @ p["lstm_wih2"] + p["lstm_b2"])
    a2 = h2 @ p["attn2_wvo"] + p["attn2_bvo"] + h2
    z = jnp.maximum(a2 @ p["cls_w1"] + p["cls_b1"], 0.0)
    logits = z @ p["cls_w2"] + p["cls_b2"]
    return logits[:, :num_classes]


if __name__ == "__main__":
    num_features, window_size, stat_dim, num_classes = 4, 16, 8, 5
    B = 2
    key = jax.random.PRNGKey(0)
    kp, kx, ks = jax.random.split(key, 3)

    params = init_params(kp, num_features, window_size, stat_dim, num_classes)
    layout, total_rows, width = _slab_layout(num_features, window_size, stat_dim)
    slab = pack_params(params, layout, total_rows, width)

    window_batch = jax.random.normal(kx, (B, window_size, num_features), jnp.float32)
    stat_batch = jax.random.normal(ks, (B, stat_dim), jnp.float32)

    fwd = jax.jit(functools.partial(cnn_lstm_forward, num_classes=num_classes))
    logits = fwd(slab, window_batch, stat_batch)
    jax.block_until_ready(logits)
    assert logits.shape == (B, num_classes), logits.shape

    ref = reference_forward(params, window_batch, stat_batch, num_classes)
    assert jnp.allclose(logits, ref, rtol=5e-2, atol=5e-2), (logits, ref)
    print("KERNEL_OK")
</pallas_src>

<mosaic_0001>
module attributes {stable_mosaic.version = 11 : i64} {
  func.func @kernel(%arg0: memref<2x16x4xf32, #tpu.memory_space<vmem>>, %arg1: memref<2x8xf32, #tpu.memory_space<vmem>>, %arg2: memref<760x192xf32, #tpu.memory_space<vmem>>, %arg3: memref<2x128xf32, #tpu.memory_space<vmem>>, %arg4: memref<2x20x4xf32, #tpu.memory_space<vmem>>, %arg5: memref<32x32xf32, #tpu.memory_space<vmem>>, %arg6: memref<2x12x32xf32, #tpu.memory_space<vmem>>, %arg7: memref<16x64xf32, #tpu.memory_space<vmem>>) attributes {dimension_semantics = [], scalar_prefetch = 0 : i64, scratch_operands = 4 : i64, tpu.core_type = #tpu.core_type<tc>} {
    %cst = arith.constant 0.000000e+00 : f32
    %0 = vector.broadcast %cst : f32 to vector<2x20x4xf32>
    %c0 = arith.constant 0 : index
    %c0_0 = arith.constant 0 : index
    %c0_1 = arith.constant 0 : index
    %1 = vector.load %arg4[%c0, %c0_0, %c0_1] : memref<2x20x4xf32, #tpu.memory_space<vmem>>, vector<2x20x4xf32>
    tpu.vector_store %arg4[%c0, %c0_0, %c0_1], %0 {strides = array<i32>} : memref<2x20x4xf32, #tpu.memory_space<vmem>>, vector<2x20x4xf32>,
    %c0_2 = arith.constant 0 : index
    %c0_3 = arith.constant 0 : index
    %c0_4 = arith.constant 0 : index
    %2 = vector.load %arg0[%c0_2, %c0_3, %c0_4] : memref<2x16x4xf32, #tpu.memory_space<vmem>>, vector<2x16x4xf32>
    %c0_5 = arith.constant 0 : index
    %c2 = arith.constant 2 : index
    %c0_6 = arith.constant 0 : index
    %3 = vector.load %arg4[%c0_5, %c2, %c0_6] : memref<2x20x4xf32, #tpu.memory_space<vmem>>, vector<2x16x4xf32>
    tpu.vector_store %arg4[%c0_5, %c2, %c0_6], %2 {strides = array<i32>} : memref<2x20x4xf32, #tpu.memory_space<vmem>>, vector<2x16x4xf32>,
    %cst_7 = arith.constant 0.000000e+00 : f32
    %4 = vector.broadcast %cst_7 : f32 to vector<32x32xf32>
    %c0_8 = arith.constant 0 : index
    %c0_9 = arith.constant 0 : index
    %c0_10 = arith.constant 0 : index
    %5 = vector.load %arg4[%c0_8, %c0_9, %c0_10] : memref<2x20x4xf32, #tpu.memory_space<vmem>>, vector<2x16x4xf32>
    %6 = vector.shape_cast %5 : vector<2x16x4xf32> to vector<32x4xf32>
    %c0_11 = arith.constant 0 : index
    %c0_12 = arith.constant 0 : index
    %7 = vector.load %arg2[%c0_11, %c0_12] : memref<760x192xf32, #tpu.memory_space<vmem>>, vector<4x32xf32>
    %cst_13 = arith.constant dense<0.000000e+00> : vector<32x32xf32>
    %8 = tpu.matmul %6, %7, %cst_13 {dimension_numbers = #tpu.dot_dimension_numbers<[1], [0], [0], [1], [0, 0, 1, 1], [], []>} : vector<32x4xf32>, vector<4x32xf32>, vector<32x32xf32> -> vector<32x32xf32>
    %9 = arith.addf %4, %8 : vector<32x32xf32>
    %c0_14 = arith.constant 0 : index
    %c1 = arith.constant 1 : index
    %c0_15 = arith.constant 0 : index
    %10 = vector.load %arg4[%c0_14, %c1, %c0_15] : memref<2x20x4xf32, #tpu.memory_space<vmem>>, vector<2x16x4xf32>
    %11 = vector.shape_cast %10 : vector<2x16x4xf32> to vector<32x4xf32>
    %c4 = arith.constant 4 : index
    %c0_16 = arith.constant 0 : index
    %12 = vector.load %arg2[%c4, %c0_16] : memref<760x192xf32, #tpu.memory_space<vmem>>, vector<4x32xf32>
    %cst_17 = arith.constant dense<0.000000e+00> : vector<32x32xf32>
    %13 = tpu.matmul %11, %12, %cst_17 {dimension_numbers = #tpu.dot_dimension_numbers<[1], [0], [0], [1], [0, 0, 1, 1], [], []>} : vector<32x4xf32>, vector<4x32xf32>, vector<32x32xf32> -> vector<32x32xf32>
    %14 = arith.addf %9, %13 : vector<32x32xf32>
    %c0_18 = arith.constant 0 : index
    %c2_19 = arith.constant 2 : index
    %c0_20 = arith.constant 0 : index
    %15 = vector.load %arg4[%c0_18, %c2_19, %c0_20] : memref<2x20x4xf32, #tpu.memory_space<vmem>>, vector<2x16x4xf32>
    %16 = vector.shape_cast %15 : vector<2x16x4xf32> to vector<32x4xf32>
    %c8 = arith.constant 8 : index
    %c0_21 = arith.constant 0 : index
    %17 = vector.load %arg2[%c8, %c0_21] : memref<760x192xf32, #tpu.memory_space<vmem>>, vector<4x32xf32>
    %cst_22 = arith.constant dense<0.000000e+00> : vector<32x32xf32>
    %18 = tpu.matmul %16, %17, %cst_22 {dimension_numbers = #tpu.dot_dimension_numbers<[1], [0], [0], [1], [0, 0, 1, 1], [], []>} : vector<32x4xf32>, vector<4x32xf32>, vector<32x32xf32> -> vector<32x32xf32>
    %19 = arith.addf %14, %18 : vector<32x32xf32>
    %c0_23 = arith.constant 0 : index
    %c3 = arith.constant 3 : index
    %c0_24 = arith.constant 0 : index
    %20 = vector.load %arg4[%c0_23, %c3, %c0_24] : memref<2x20x4xf32, #tpu.memory_space<vmem>>, vector<2x16x4xf32>
    %21 = vector.shape_cast %20 : vector<2x16x4xf32> to vector<32x4xf32>
    %c12 = arith.constant 12 : index
    %c0_25 = arith.constant 0 : index
    %22 = vector.load %arg2[%c12, %c0_25] : memref<760x192xf32, #tpu.memory_space<vmem>>, vector<4x32xf32>
    %cst_26 = arith.constant dense<0.000000e+00> : vector<32x32xf32>
    %23 = tpu.matmul %21, %22, %cst_26 {dimension_numbers = #tpu.dot_dimension_numbers<[1], [0], [0], [1], [0, 0, 1, 1], [], []>} : vector<32x4xf32>, vector<4x32xf32>, vector<32x32xf32> -> vector<32x32xf32>
    %24 = arith.addf %19, %23 : vector<32x32xf32>
    %c0_27 = arith.constant 0 : index
    %c4_28 = arith.constant 4 : index
    %c0_29 = arith.constant 0 : index
    %25 = vector.load %arg4[%c0_27, %c4_28, %c0_29] : memref<2x20x4xf32, #tpu.memory_space<vmem>>, vector<2x16x4xf32>
    %26 = vector.shape_cast %25 : vector<2x16x4xf32> to vector<32x4xf32>
    %c16 = arith.constant 16 : index
    %c0_30 = arith.constant 0 : index
    %27 = vector.load %arg2[%c16, %c0_30] : memref<760x192xf32, #tpu.memory_space<vmem>>, vector<4x32xf32>
    %cst_31 = arith.constant dense<0.000000e+00> : vector<32x32xf32>
    %28 = tpu.matmul %26, %27, %cst_31 {dimension_numbers = #tpu.dot_dimension_numbers<[1], [0], [0], [1], [0, 0, 1, 1], [], []>} : vector<32x4xf32>, vector<4x32xf32>, vector<32x32xf32> -> vector<32x32xf32>
    %29 = arith.addf %24, %28 : vector<32x32xf32>
    %c24 = arith.constant 24 : index
    %c0_32 = arith.constant 0 : index
    %30 = vector.load %arg2[%c24, %c0_32] : memref<760x192xf32, #tpu.memory_space<vmem>>, vector<1x32xf32>
    %31 = vector.broadcast %30 : vector<1x32xf32> to vector<32x32xf32>
    %32 = arith.addf %29, %31 : vector<32x32xf32>
    %cst_33 = arith.constant 0.000000e+00 : f32
    %33 = vector.broadcast %cst_33 : f32 to vector<32x32xf32>
    %34 = arith.maximumf %32, %33 : vector<32x32xf32>
    %c0_34 = arith.constant 0 : index
    %c0_35 = arith.constant 0 : index
    %35 = vector.load %arg5[%c0_34, %c0_35] : memref<32x32xf32, #tpu.memory_space<vmem>>, vector<32x32xf32>
    tpu.vector_store %arg5[%c0_34, %c0_35], %34 {strides = array<i32>} : memref<32x32xf32, #tpu.memory_space<vmem>>, vector<32x32xf32>,
    %c0_36 = arith.constant 0 : index
    %c0_37 = arith.constant 0 : index
    %36 = tpu.strided_load %arg5[%c0_36, %c0_37] {strides = array<i32: 2, 1>} : memref<32x32xf32, #tpu.memory_space<vmem>>, vector<16x32xf32>
    %c1_38 = arith.constant 1 : index
    %c0_39 = arith.constant 0 : index
    %37 = tpu.strided_load %arg5[%c1_38, %c0_39] {strides = array<i32: 2, 1>} : memref<32x32xf32, #tpu.memory_space<vmem>>, vector<16x32xf32>
    %38 = arith.maximumf %36, %37 : vector<16x32xf32>
    %cst_40 = arith.constant 0.000000e+00 : f32
    %39 = vector.broadcast %cst_40 : f32 to vector<2x12x32xf32>
    %c0_41 = arith.constant 0 : index
    %c0_42 = arith.constant 0 : index
    %c0_43 = arith.constant 0 : index
    %40 = vector.load %arg6[%c0_41, %c0_42, %c0_43] : memref<2x12x32xf32, #tpu.memory_space<vmem>>, vector<2x12x32xf32>
    tpu.vector_store %arg6[%c0_41, %c0_42, %c0_43], %39 {strides = array<i32>} : memref<2x12x32xf32, #tpu.memory_space<vmem>>, vector<2x12x32xf32>,
    %41 = vector.shape_cast %38 : vector<16x32xf32> to vector<2x8x32xf32>
    %c0_44 = arith.constant 0 : index
    %c2_45 = arith.constant 2 : index
    %c0_46 = arith.constant 0 : index
    %42 = vector.load %arg6[%c0_44, %c2_45, %c0_46] : memref<2x12x32xf32, #tpu.memory_space<vmem>>, vector<2x8x32xf32>
    tpu.vector_store %arg6[%c0_44, %c2_45, %c0_46], %41 {strides = array<i32>} : memref<2x12x32xf32, #tpu.memory_space<vmem>>, vector<2x8x32xf32>,
    %cst_47 = arith.constant 0.000000e+00 : f32
    %43 = vector.broadcast %cst_47 : f32 to vector<16x64xf32>
    %c0_48 = arith.constant 0 : index
    %c0_49 = arith.constant 0 : index
    %c0_50 = arith.constant 0 : index
    %44 = vector.load %arg6[%c0_48, %c0_49, %c0_50] : memref<2x12x32xf32, #tpu.memory_space<vmem>>, vector<2x8x32xf32>
    %45 = vector.shape_cast %44 : vector<2x8x32xf32> to vector<16x32xf32>
    %c32 = arith.constant 32 : index
    %c0_51 = arith.constant 0 : index
    %46 = vector.load %arg2[%c32, %c0_51] : memref<760x192xf32, #tpu.memory_space<vmem>>, vector<32x64xf32>
    %cst_52 = arith.constant dense<0.000000e+00> : vector<16x64xf32>
    %47 = tpu.matmul %45, %46, %cst_52 {dimension_numbers = #tpu.dot_dimension_numbers<[1], [0], [0], [1], [0, 0, 1, 1], [], []>} : vector<16x32xf32>, vector<32x64xf32>, vector<16x64xf32> -> vector<16x64xf32>
    %48 = arith.addf %43, %47 : vector<16x64xf32>
    %c0_53 = arith.constant 0 : index
    %c1_54 = arith.constant 1 : index
    %c0_55 = arith.constant 0 : index
    %49 = vector.load %arg6[%c0_53, %c1_54, %c0_55] : memref<2x12x32xf32, #tpu.memory_space<vmem>>, vector<2x8x32xf32>
    %50 = vector.shape_cast %49 : vector<2x8x32xf32> to vector<16x32xf32>
    %c64 = arith.constant 64 : index
    %c0_56 = arith.constant 0 : index
    %51 = vector.load %arg2[%c64, %c0_56] : memref<760x192xf32, #tpu.memory_space<vmem>>, vector<32x64xf32>
    %cst_57 = arith.constant dense<0.000000e+00> : vector<16x64xf32>
    %52 = tpu.matmul %50, %51, %cst_57 {dimension_numbers = #tpu.dot_dimension_numbers<[1], [0], [0], [1], [0, 0, 1, 1], [], []>} : vector<16x32xf32>, vector<32x64xf32>, vector<16x64xf32> -> vector<16x64xf32>
    %53 = arith.addf %48, %52 : vector<16x64xf32>
    %c0_58 = arith.constant 0 : index
    %c2_59 = arith.constant 2 : index
    %c0_60 = arith.constant 0 : index
    %54 = vector.load %arg6[%c0_58, %c2_59, %c0_60] : memref<2x12x32xf32, #tpu.memory_space<vmem>>, vector<2x8x32xf32>
    %55 = vector.shape_cast %54 : vector<2x8x32xf32> to vector<16x32xf32>
    %c96 = arith.constant 96 : index
    %c0_61 = arith.constant 0 : index
    %56 = vector.load %arg2[%c96, %c0_61] : memref<760x192xf32, #tpu.memory_space<vmem>>, vector<32x64xf32>
    %cst_62 = arith.constant dense<0.000000e+00> : vector<16x64xf32>
    %57 = tpu.matmul %55, %56, %cst_62 {dimension_numbers = #tpu.dot_dimension_numbers<[1], [0], [0], [1], [0, 0, 1, 1], [], []>} : vector<16x32xf32>, vector<32x64xf32>, vector<16x64xf32> -> vector<16x64xf32>
    %58 = arith.addf %53, %57 : vector<16x64xf32>
    %c0_63 = arith.constant 0 : index
    %c3_64 = arith.constant 3 : index
    %c0_65 = arith.constant 0 : index
    %59 = vector.load %arg6[%c0_63, %c3_64, %c0_65] : memref<2x12x32xf32, #tpu.memory_space<vmem>>, vector<2x8x32xf32>
    %60 = vector.shape_cast %59 : vector<2x8x32xf32> to vector<16x32xf32>
    %c128 = arith.constant 128 : index
    %c0_66 = arith.constant 0 : index
    %61 = vector.load %arg2[%c128, %c0_66] : memref<760x192xf32, #tpu.memory_space<vmem>>, vector<32x64xf32>
    %cst_67 = arith.constant dense<0.000000e+00> : vector<16x64xf32>
    %62 = tpu.matmul %60, %61, %cst_67 {dimension_numbers = #tpu.dot_dimension_numbers<[1], [0], [0], [1], [0, 0, 1, 1], [], []>} : vector<16x32xf32>, vector<32x64xf32>, vector<16x64xf32> -> vector<16x64xf32>
    %63 = arith.addf %58, %62 : vector<16x64xf32>
    %c0_68 = arith.constant 0 : index
    %c4_69 = arith.constant 4 : index
    %c0_70 = arith.constant 0 : index
    %64 = vector.load %arg6[%c0_68, %c4_69, %c0_70] : memref<2x12x32xf32, #tpu.memory_space<vmem>>, vector<2x8x32xf32>
    %65 = vector.shape_cast %64 : vector<2x8x32xf32> to vector<16x32xf32>
    %c160 = arith.constant 160 : index
    %c0_71 = arith.constant 0 : index
    %66 = vector.load %arg2[%c160, %c0_71] : memref<760x192xf32, #tpu.memory_space<vmem>>, vector<32x64xf32>
    %cst_72 = arith.constant dense<0.000000e+00> : vector<16x64xf32>
    %67 = tpu.matmul %65, %66, %cst_72 {dimension_numbers = #tpu.dot_dimension_numbers<[1], [0], [0], [1], [0, 0, 1, 1], [], []>} : vector<16x32xf32>, vector<32x64xf32>, vector<16x64xf32> -> vector<16x64xf32>
    %68 = arith.addf %63, %67 : vector<16x64xf32>
    %c192 = arith.constant 192 : index
    %c0_73 = arith.constant 0 : index
    %69 = vector.load %arg2[%c192, %c0_73] : memref<760x192xf32, #tpu.memory_space<vmem>>, vector<1x64xf32>
    %70 = vector.broadcast %69 : vector<1x64xf32> to vector<16x64xf32>
    %71 = arith.addf %68, %70 : vector<16x64xf32>
    %cst_74 = arith.constant 0.000000e+00 : f32
    %72 = vector.broadcast %cst_74 : f32 to vector<16x64xf32>
    %73 = arith.maximumf %71, %72 : vector<16x64xf32>
    %c0_75 = arith.constant 0 : index
    %c0_76 = arith.constant 0 : index
    %74 = vector.load %arg7[%c0_75, %c0_76] : memref<16x64xf32, #tpu.memory_space<vmem>>, vector<16x64xf32>
    tpu.vector_store %arg7[%c0_75, %c0_76], %73 {strides = array<i32>} : memref<16x64xf32, #tpu.memory_space<vmem>>, vector<16x64xf32>,
    %c0_77 = arith.constant 0 : index
    %c0_78 = arith.constant 0 : index
    %75 = tpu.strided_load %arg7[%c0_77, %c0_78] {strides = array<i32: 2, 1>} : memref<16x64xf32, #tpu.memory_space<vmem>>, vector<8x64xf32>
    %c1_79 = arith.constant 1 : index
    %c0_80 = arith.constant 0 : index
    %76 = tpu.strided_load %arg7[%c1_79, %c0_80] {strides = array<i32: 2, 1>} : memref<16x64xf32, #tpu.memory_space<vmem>>, vector<8x64xf32>
    %77 = arith.maximumf %75, %76 : vector<8x64xf32>
    %c200 = arith.constant 200 : index
    %c0_81 = arith.constant 0 : index
    %78 = vector.load %arg2[%c200, %c0_81] : memref<760x192xf32, #tpu.memory_space<vmem>>, vector<64x192xf32>
    %cst_82 = arith.constant dense<0.000000e+00> : vector<8x192xf32>
    %79 = tpu.matmul %77, %78, %cst_82 {dimension_numbers = #tpu.dot_dimension_numbers<[1], [0], [0], [1], [0, 0, 1, 1], [], []>} : vector<8x64xf32>, vector<64x192xf32>, vector<8x192xf32> -> vector<8x192xf32>
    %c264 = arith.constant 264 : index
    %c0_83 = arith.constant 0 : index
    %80 = vector.load %arg2[%c264, %c0_83] : memref<760x192xf32, #tpu.memory_space<vmem>>, vector<1x192xf32>
    %81 = vector.broadcast %80 : vector<1x192xf32> to vector<8x192xf32>
    %82 = arith.addf %79, %81 : vector<8x192xf32>
    %83 = vector.extract_strided_slice %82 {offsets = [0, 0], sizes = [8, 64], strides = [1, 1]} : vector<8x192xf32> to vector<8x64xf32>
    %84 = vector.shape_cast %83 : vector<8x64xf32> to vector<2x4x64xf32>
    %85 = vector.extract_strided_slice %82 {offsets = [0, 64], sizes = [8, 64], strides = [1, 1]} : vector<8x192xf32> to vector<8x64xf32>
    %86 = vector.shape_cast %85 : vector<8x64xf32> to vector<2x4x64xf32>
    %87 = vector.extract_strided_slice %82 {offsets = [0, 128], sizes = [8, 64], strides = [1, 1]} : vector<8x192xf32> to vector<8x64xf32>
    %88 = vector.shape_cast %87 : vector<8x64xf32> to vector<2x4x64xf32>
    %cst_84 = arith.constant 0.000000e+00 : f32
    %89 = vector.broadcast %cst_84 : f32 to vector<8x64xf32>
    %90 = vector.extract_strided_slice %84 {offsets = [0, 0, 0], sizes = [2, 4, 16], strides = [1, 1, 1]} : vector<2x4x64xf32> to vector<2x4x16xf32>
    %91 = vector.extract_strided_slice %86 {offsets = [0, 0, 0], sizes = [2, 4, 16], strides = [1, 1, 1]} : vector<2x4x64xf32> to vector<2x4x16xf32>
    "tpu.trace_start"() <{level = 10 : i32, message = "bqd,bkd->bqk"}> : () -> ()
    %cst_85 = arith.constant dense<0.000000e+00> : vector<2x4x4xf32>
    %92 = tpu.matmul %90, %91, %cst_85 {dimension_numbers = #tpu.dot_dimension_numbers<[2], [2], [1], [1], [0, 0, 0, 1, 1, 1], [0], [0]>} : vector<2x4x16xf32>, vector<2x4x16xf32>, vector<2x4x4xf32> -> vector<2x4x4xf32>
    "tpu.trace_stop"() : () -> ()
    %cst_86 = arith.constant dense<0xFF800000> : vector<2x4xf32>
    %93 = vector.multi_reduction <maximumf>, %92, %cst_86 [2] : vector<2x4x4xf32> to vector<2x4xf32>
    %94 = vector.shape_cast %93 : vector<2x4xf32> to vector<2x4x1xf32>
    %95 = vector.broadcast %94 : vector<2x4x1xf32> to vector<2x4x4xf32>
    %96 = arith.subf %92, %95 : vector<2x4x4xf32>
    %97 = math.exp %96 : vector<2x4x4xf32>
    %cst_87 = arith.constant dense<0.000000e+00> : vector<2x4xf32>
    %98 = vector.multi_reduction <add>, %97, %cst_87 [2] : vector<2x4x4xf32> to vector<2x4xf32>
    %99 = vector.shape_cast %98 : vector<2x4xf32> to vector<2x4x1xf32>
    %100 = tpu.reciprocal %99 {approx = true} : vector<2x4x1xf32> -> vector<2x4x1xf32>
    %101 = vector.broadcast %100 : vector<2x4x1xf32> to vector<2x4x4xf32>
    %102 = arith.mulf %97, %101 : vector<2x4x4xf32>
    %103 = vector.extract_strided_slice %88 {offsets = [0, 0, 0], sizes = [2, 4, 16], strides = [1, 1, 1]} : vector<2x4x64xf32> to vector<2x4x16xf32>
    "tpu.trace_start"() <{level = 10 : i32, message = "bqk,bkd->bqd"}> : () -> ()
    %cst_88 = arith.constant dense<0.000000e+00> : vector<2x4x16xf32>
    %104 = tpu.matmul %102, %103, %cst_88 {dimension_numbers = #tpu.dot_dimension_numbers<[2], [1], [1], [2], [0, 0, 0, 1, 1, 2], [0], [0]>} : vector<2x4x4xf32>, vector<2x4x16xf32>, vector<2x4x16xf32> -> vector<2x4x16xf32>
    "tpu.trace_stop"() : () -> ()
    %105 = vector.shape_cast %104 : vector<2x4x16xf32> to vector<8x16xf32>
    %c272 = arith.constant 272 : index
    %c0_89 = arith.constant 0 : index
    %106 = vector.load %arg2[%c272, %c0_89] : memref<760x192xf32, #tpu.memory_space<vmem>>, vector<16x64xf32>
    %cst_90 = arith.constant dense<0.000000e+00> : vector<8x64xf32>
    %107 = tpu.matmul %105, %106, %cst_90 {dimension_numbers = #tpu.dot_dimension_numbers<[1], [0], [0], [1], [0, 0, 1, 1], [], []>} : vector<8x16xf32>, vector<16x64xf32>, vector<8x64xf32> -> vector<8x64xf32>
    %108 = arith.addf %89, %107 : vector<8x64xf32>
    %109 = vector.extract_strided_slice %84 {offsets = [0, 0, 16], sizes = [2, 4, 16], strides = [1, 1, 1]} : vector<2x4x64xf32> to vector<2x4x16xf32>
    %110 = vector.extract_strided_slice %86 {offsets = [0, 0, 16], sizes = [2, 4, 16], strides = [1, 1, 1]} : vector<2x4x64xf32> to vector<2x4x16xf32>
    "tpu.trace_start"() <{level = 10 : i32, message = "bqd,bkd->bqk"}> : () -> ()
    %cst_91 = arith.constant dense<0.000000e+00> : vector<2x4x4xf32>
    %111 = tpu.matmul %109, %110, %cst_91 {dimension_numbers = #tpu.dot_dimension_numbers<[2], [2], [1], [1], [0, 0, 0, 1, 1, 1], [0], [0]>} : vector<2x4x16xf32>, vector<2x4x16xf32>, vector<2x4x4xf32> -> vector<2x4x4xf32>
    "tpu.trace_stop"() : () -> ()
    %cst_92 = arith.constant dense<0xFF800000> : vector<2x4xf32>
    %112 = vector.multi_reduction <maximumf>, %111, %cst_92 [2] : vector<2x4x4xf32> to vector<2x4xf32>
    %113 = vector.shape_cast %112 : vector<2x4xf32> to vector<2x4x1xf32>
    %114 = vector.broadcast %113 : vector<2x4x1xf32> to vector<2x4x4xf32>
    %115 = arith.subf %111, %114 : vector<2x4x4xf32>
    %116 = math.exp %115 : vector<2x4x4xf32>
    %cst_93 = arith.constant dense<0.000000e+00> : vector<2x4xf32>
    %117 = vector.multi_reduction <add>, %116, %cst_93 [2] : vector<2x4x4xf32> to vector<2x4xf32>
    %118 = vector.shape_cast %117 : vector<2x4xf32> to vector<2x4x1xf32>
    %119 = tpu.reciprocal %118 {approx = true} : vector<2x4x1xf32> -> vector<2x4x1xf32>
    %120 = vector.broadcast %119 : vector<2x4x1xf32> to vector<2x4x4xf32>
    %121 = arith.mulf %116, %120 : vector<2x4x4xf32>
    %122 = vector.extract_strided_slice %88 {offsets = [0, 0, 16], sizes = [2, 4, 16], strides = [1, 1, 1]} : vector<2x4x64xf32> to vector<2x4x16xf32>
    "tpu.trace_start"() <{level = 10 : i32, message = "bqk,bkd->bqd"}> : () -> ()
    %cst_94 = arith.constant dense<0.000000e+00> : vector<2x4x16xf32>
    %123 = tpu.matmul %121, %122, %cst_94 {dimension_numbers = #tpu.dot_dimension_numbers<[2], [1], [1], [2], [0, 0, 0, 1, 1, 2], [0], [0]>} : vector<2x4x4xf32>, vector<2x4x16xf32>, vector<2x4x16xf32> -> vector<2x4x16xf32>
    "tpu.trace_stop"() : () -> ()
    %124 = vector.shape_cast %123 : vector<2x4x16xf32> to vector<8x16xf32>
    %c288 = arith.constant 288 : index
    %c0_95 = arith.constant 0 : index
    %125 = vector.load %arg2[%c288, %c0_95] : memref<760x192xf32, #tpu.memory_space<vmem>>, vector<16x64xf32>
    %cst_96 = arith.constant dense<0.000000e+00> : vector<8x64xf32>
    %126 = tpu.matmul %124, %125, %cst_96 {dimension_numbers = #tpu.dot_dimension_numbers<[1], [0], [0], [1], [0, 0, 1, 1], [], []>} : vector<8x16xf32>, vector<16x64xf32>, vector<8x64xf32> -> vector<8x64xf32>
    %127 = arith.addf %108, %126 : vector<8x64xf32>
    %128 = vector.extract_strided_slice %84 {offsets = [0, 0, 32], sizes = [2, 4, 16], strides = [1, 1, 1]} : vector<2x4x64xf32> to vector<2x4x16xf32>
    %129 = vector.extract_strided_slice %86 {offsets = [0, 0, 32], sizes = [2, 4, 16], strides = [1, 1, 1]} : vector<2x4x64xf32> to vector<2x4x16xf32>
    "tpu.trace_start"() <{level = 10 : i32, message = "bqd,bkd->bqk"}> : () -> ()
    %cst_97 = arith.constant dense<0.000000e+00> : vector<2x4x4xf32>
    %130 = tpu.matmul %128, %129, %cst_97 {dimension_numbers = #tpu.dot_dimension_numbers<[2], [2], [1], [1], [0, 0, 0, 1, 1, 1], [0], [0]>} : vector<2x4x16xf32>, vector<2x4x16xf32>, vector<2x4x4xf32> -> vector<2x4x4xf32>
    "tpu.trace_stop"() : () -> ()
    %cst_98 = arith.constant dense<0xFF800000> : vector<2x4xf32>
    %131 = vector.multi_reduction <maximumf>, %130, %cst_98 [2] : vector<2x4x4xf32> to vector<2x4xf32>
    %132 = vector.shape_cast %131 : vector<2x4xf32> to vector<2x4x1xf32>
    %133 = vector.broadcast %132 : vector<2x4x1xf32> to vector<2x4x4xf32>
    %134 = arith.subf %130, %133 : vector<2x4x4xf32>
    %135 = math.exp %134 : vector<2x4x4xf32>
    %cst_99 = arith.constant dense<0.000000e+00> : vector<2x4xf32>
    %136 = vector.multi_reduction <add>, %135, %cst_99 [2] : vector<2x4x4xf32> to vector<2x4xf32>
    %137 = vector.shape_cast %136 : vector<2x4xf32> to vector<2x4x1xf32>
    %138 = tpu.reciprocal %137 {approx = true} : vector<2x4x1xf32> -> vector<2x4x1xf32>
    %139 = vector.broadcast %138 : vector<2x4x1xf32> to vector<2x4x4xf32>
    %140 = arith.mulf %135, %139 : vector<2x4x4xf32>
    %141 = vector.extract_strided_slice %88 {offsets = [0, 0, 32], sizes = [2, 4, 16], strides = [1, 1, 1]} : vector<2x4x64xf32> to vector<2x4x16xf32>
    "tpu.trace_start"() <{level = 10 : i32, message = "bqk,bkd->bqd"}> : () -> ()
    %cst_100 = arith.constant dense<0.000000e+00> : vector<2x4x16xf32>
    %142 = tpu.matmul %140, %141, %cst_100 {dimension_numbers = #tpu.dot_dimension_numbers<[2], [1], [1], [2], [0, 0, 0, 1, 1, 2], [0], [0]>} : vector<2x4x4xf32>, vector<2x4x16xf32>, vector<2x4x16xf32> -> vector<2x4x16xf32>
    "tpu.trace_stop"() : () -> ()
    %143 = vector.shape_cast %142 : vector<2x4x16xf32> to vector<8x16xf32>
    %c304 = arith.constant 304 : index
    %c0_101 = arith.constant 0 : index
    %144 = vector.load %arg2[%c304, %c0_101] : memref<760x192xf32, #tpu.memory_space<vmem>>, vector<16x64xf32>
    %cst_102 = arith.constant dense<0.000000e+00> : vector<8x64xf32>
    %145 = tpu.matmul %143, %144, %cst_102 {dimension_numbers = #tpu.dot_dimension_numbers<[1], [0], [0], [1], [0, 0, 1, 1], [], []>} : vector<8x16xf32>, vector<16x64xf32>, vector<8x64xf32> -> vector<8x64xf32>
    %146 = arith.addf %127, %145 : vector<8x64xf32>
    %147 = vector.extract_strided_slice %84 {offsets = [0, 0, 48], sizes = [2, 4, 16], strides = [1, 1, 1]} : vector<2x4x64xf32> to vector<2x4x16xf32>
    %148 = vector.extract_strided_slice %86 {offsets = [0, 0, 48], sizes = [2, 4, 16], strides = [1, 1, 1]} : vector<2x4x64xf32> to vector<2x4x16xf32>
    "tpu.trace_start"() <{level = 10 : i32, message = "bqd,bkd->bqk"}> : () -> ()
    %cst_103 = arith.constant dense<0.000000e+00> : vector<2x4x4xf32>
    %149 = tpu.matmul %147, %148, %cst_103 {dimension_numbers = #tpu.dot_dimension_numbers<[2], [2], [1], [1], [0, 0, 0, 1, 1, 1], [0], [0]>} : vector<2x4x16xf32>, vector<2x4x16xf32>, vector<2x4x4xf32> -> vector<2x4x4xf32>
    "tpu.trace_stop"() : () -> ()
    %cst_104 = arith.constant dense<0xFF800000> : vector<2x4xf32>
    %150 = vector.multi_reduction <maximumf>, %149, %cst_104 [2] : vector<2x4x4xf32> to vector<2x4xf32>
    %151 = vector.shape_cast %150 : vector<2x4xf32> to vector<2x4x1xf32>
    %152 = vector.broadcast %151 : vector<2x4x1xf32> to vector<2x4x4xf32>
    %153 = arith.subf %149, %152 : vector<2x4x4xf32>
    %154 = math.exp %153 : vector<2x4x4xf32>
    %cst_105 = arith.constant dense<0.000000e+00> : vector<2x4xf32>
    %155 = vector.multi_reduction <add>, %154, %cst_105 [2] : vector<2x4x4xf32> to vector<2x4xf32>
    %156 = vector.shape_cast %155 : vector<2x4xf32> to vector<2x4x1xf32>
    %157 = tpu.reciprocal %156 {approx = true} : vector<2x4x1xf32> -> vector<2x4x1xf32>
    %158 = vector.broadcast %157 : vector<2x4x1xf32> to vector<2x4x4xf32>
    %159 = arith.mulf %154, %158 : vector<2x4x4xf32>
    %160 = vector.extract_strided_slice %88 {offsets = [0, 0, 48], sizes = [2, 4, 16], strides = [1, 1, 1]} : vector<2x4x64xf32> to vector<2x4x16xf32>
    "tpu.trace_start"() <{level = 10 : i32, message = "bqk,bkd->bqd"}> : () -> ()
    %cst_106 = arith.constant dense<0.000000e+00> : vector<2x4x16xf32>
    %161 = tpu.matmul %159, %160, %cst_106 {dimension_numbers = #tpu.dot_dimension_numbers<[2], [1], [1], [2], [0, 0, 0, 1, 1, 2], [0], [0]>} : vector<2x4x4xf32>, vector<2x4x16xf32>, vector<2x4x16xf32> -> vector<2x4x16xf32>
    "tpu.trace_stop"() : () -> ()
    %162 = vector.shape_cast %161 : vector<2x4x16xf32> to vector<8x16xf32>
    %c320 = arith.constant 320 : index
    %c0_107 = arith.constant 0 : index
    %163 = vector.load %arg2[%c320, %c0_107] : memref<760x192xf32, #tpu.memory_space<vmem>>, vector<16x64xf32>
    %cst_108 = arith.constant dense<0.000000e+00> : vector<8x64xf32>
    %164 = tpu.matmul %162, %163, %cst_108 {dimension_numbers = #tpu.dot_dimension_numbers<[1], [0], [0], [1], [0, 0, 1, 1], [], []>} : vector<8x16xf32>, vector<16x64xf32>, vector<8x64xf32> -> vector<8x64xf32>
    %165 = arith.addf %146, %164 : vector<8x64xf32>
    %c336 = arith.constant 336 : index
    %c0_109 = arith.constant 0 : index
    %166 = vector.load %arg2[%c336, %c0_109] : memref<760x192xf32, #tpu.memory_space<vmem>>, vector<1x64xf32>
    %167 = vector.broadcast %166 : vector<1x64xf32> to vector<8x64xf32>
    %168 = arith.addf %165, %167 : vector<8x64xf32>
    %169 = arith.addf %168, %77 : vector<8x64xf32>
    %170 = vector.shape_cast %169 : vector<8x64xf32> to vector<2x4x64xf32>
    %c0_110 = arith.constant 0 : index
    %c0_111 = arith.constant 0 : index
    %171 = vector.load %arg1[%c0_110, %c0_111] : memref<2x8xf32, #tpu.memory_space<vmem>>, vector<2x8xf32>
    %c600 = arith.constant 600 : index
    %c0_112 = arith.constant 0 : index
    %172 = vector.load %arg2[%c600, %c0_112] : memref<760x192xf32, #tpu.memory_space<vmem>>, vector<8x128xf32>
    %cst_113 = arith.constant dense<0.000000e+00> : vector<2x128xf32>
    %173 = tpu.matmul %171, %172, %cst_113 {dimension_numbers = #tpu.dot_dimension_numbers<[1], [0], [0], [1], [0, 0, 1, 1], [], []>} : vector<2x8xf32>, vector<8x128xf32>, vector<2x128xf32> -> vector<2x128xf32>
    %c608 = arith.constant 608 : index
    %c0_114 = arith.constant 0 : index
    %174 = vector.load %arg2[%c608, %c0_114] : memref<760x192xf32, #tpu.memory_space<vmem>>, vector<1x128xf32>
    %175 = vector.broadcast %174 : vector<1x128xf32> to vector<2x128xf32>
    %176 = arith.addf %173, %175 : vector<2x128xf32>
    %177 = vector.extract_strided_slice %170 {offsets = [0, 0, 0], sizes = [2, 1, 64], strides = [1, 1, 1]} : vector<2x4x64xf32> to vector<2x1x64xf32>
    %178 = vector.shape_cast %177 : vector<2x1x64xf32> to vector<2x64xf32>
    %c344 = arith.constant 344 : index
    %c0_115 = arith.constant 0 : index
    %179 = vector.load %arg2[%c344, %c0_115] : memref<760x192xf32, #tpu.memory_space<vmem>>, vector<64x128xf32>
    %cst_116 = arith.constant dense<0.000000e+00> : vector<2x128xf32>
    %180 = tpu.matmul %178, %179, %cst_116 {dimension_numbers = #tpu.dot_dimension_numbers<[1], [0], [0], [1], [0, 0, 1, 1], [], []>} : vector<2x64xf32>, vector<64x128xf32>, vector<2x128xf32> -> vector<2x128xf32>
    %181 = arith.addf %176, %180 : vector<2x128xf32>
    %182 = vector.extract_strided_slice %170 {offsets = [0, 1, 0], sizes = [2, 1, 64], strides = [1, 1, 1]} : vector<2x4x64xf32> to vector<2x1x64xf32>
    %183 = vector.shape_cast %182 : vector<2x1x64xf32> to vector<2x64xf32>
    %c408 = arith.constant 408 : index
    %c0_117 = arith.constant 0 : index
    %184 = vector.load %arg2[%c408, %c0_117] : memref<760x192xf32, #tpu.memory_space<vmem>>, vector<64x128xf32>
    %cst_118 = arith.constant dense<0.000000e+00> : vector<2x128xf32>
    %185 = tpu.matmul %183, %184, %cst_118 {dimension_numbers = #tpu.dot_dimension_numbers<[1], [0], [0], [1], [0, 0, 1, 1], [], []>} : vector<2x64xf32>, vector<64x128xf32>, vector<2x128xf32> -> vector<2x128xf32>
    %186 = arith.addf %181, %185 : vector<2x128xf32>
    %187 = vector.extract_strided_slice %170 {offsets = [0, 2, 0], sizes = [2, 1, 64], strides = [1, 1, 1]} : vector<2x4x64xf32> to vector<2x1x64xf32>
    %188 = vector.shape_cast %187 : vector<2x1x64xf32> to vector<2x64xf32>
    %c472 = arith.constant 472 : index
    %c0_119 = arith.constant 0 : index
    %189 = vector.load %arg2[%c472, %c0_119] : memref<760x192xf32, #tpu.memory_space<vmem>>, vector<64x128xf32>
    %cst_120 = arith.constant dense<0.000000e+00> : vector<2x128xf32>
    %190 = tpu.matmul %188, %189, %cst_120 {dimension_numbers = #tpu.dot_dimension_numbers<[1], [0], [0], [1], [0, 0, 1, 1], [], []>} : vector<2x64xf32>, vector<64x128xf32>, vector<2x128xf32> -> vector<2x128xf32>
    %191 = arith.addf %186, %190 : vector<2x128xf32>
    %192 = vector.extract_strided_slice %170 {offsets = [0, 3, 0], sizes = [2, 1, 64], strides = [1, 1, 1]} : vector<2x4x64xf32> to vector<2x1x64xf32>
    %193 = vector.shape_cast %192 : vector<2x1x64xf32> to vector<2x64xf32>
    %c536 = arith.constant 536 : index
    %c0_121 = arith.constant 0 : index
    %194 = vector.load %arg2[%c536, %c0_121] : memref<760x192xf32, #tpu.memory_space<vmem>>, vector<64x128xf32>
    %cst_122 = arith.constant dense<0.000000e+00> : vector<2x128xf32>
    %195 = tpu.matmul %193, %194, %cst_122 {dimension_numbers = #tpu.dot_dimension_numbers<[1], [0], [0], [1], [0, 0, 1, 1], [], []>} : vector<2x64xf32>, vector<64x128xf32>, vector<2x128xf32> -> vector<2x128xf32>
    %196 = arith.addf %191, %195 : vector<2x128xf32>
    %197 = vector.extract_strided_slice %196 {offsets = [0, 0], sizes = [2, 32], strides = [1, 1]} : vector<2x128xf32> to vector<2x32xf32>
    %198 = arith.negf %197 : vector<2x32xf32>
    %199 = math.exp %198 : vector<2x32xf32>
    %cst_123 = arith.constant 1.000000e+00 : f32
    %200 = vector.broadcast %cst_123 : f32 to vector<2x32xf32>
    %201 = arith.addf %200, %199 : vector<2x32xf32>
    %202 = arith.divf %200, %201 : vector<2x32xf32>
    %203 = vector.extract_strided_slice %196 {offsets = [0, 64], sizes = [2, 32], strides = [1, 1]} : vector<2x128xf32> to vector<2x32xf32>
    %204 = math.tanh %203 : vector<2x32xf32>
    %205 = vector.extract_strided_slice %196 {offsets = [0, 96], sizes = [2, 32], strides = [1, 1]} : vector<2x128xf32> to vector<2x32xf32>
    %206 = arith.negf %205 : vector<2x32xf32>
    %207 = math.exp %206 : vector<2x32xf32>
    %cst_124 = arith.constant 1.000000e+00 : f32
    %208 = vector.broadcast %cst_124 : f32 to vector<2x32xf32>
    %209 = arith.addf %208, %207 : vector<2x32xf32>
    %210 = arith.divf %208, %209 : vector<2x32xf32>
    %211 = arith.mulf %202, %204 : vector<2x32xf32>
    %212 = math.tanh %211 : vector<2x32xf32>
    %213 = arith.mulf %210, %212 : vector<2x32xf32>
    %c616 = arith.constant 616 : index
    %c0_125 = arith.constant 0 : index
    %214 = vector.load %arg2[%c616, %c0_125] : memref<760x192xf32, #tpu.memory_space<vmem>>, vector<32x128xf32>
    %cst_126 = arith.constant dense<0.000000e+00> : vector<2x128xf32>
    %215 = tpu.matmul %213, %214, %cst_126 {dimension_numbers = #tpu.dot_dimension_numbers<[1], [0], [0], [1], [0, 0, 1, 1], [], []>} : vector<2x32xf32>, vector<32x128xf32>, vector<2x128xf32> -> vector<2x128xf32>
    %c648 = arith.constant 648 : index
    %c0_127 = arith.constant 0 : index
    %216 = vector.load %arg2[%c648, %c0_127] : memref<760x192xf32, #tpu.memory_space<vmem>>, vector<1x128xf32>
    %217 = vector.broadcast %216 : vector<1x128xf32> to vector<2x128xf32>
    %218 = arith.addf %215, %217 : vector<2x128xf32>
    %219 = vector.extract_strided_slice %218 {offsets = [0, 0], sizes = [2, 32], strides = [1, 1]} : vector<2x128xf32> to vector<2x32xf32>
    %220 = arith.negf %219 : vector<2x32xf32>
    %221 = math.exp %220 : vector<2x32xf32>
    %cst_128 = arith.constant 1.000000e+00 : f32
    %222 = vector.broadcast %cst_128 : f32 to vector<2x32xf32>
    %223 = arith.addf %222, %221 : vector<2x32xf32>
    %224 = arith.divf %222, %223 : vector<2x32xf32>
    %225 = vector.extract_strided_slice %218 {offsets = [0, 64], sizes = [2, 32], strides = [1, 1]} : vector<2x128xf32> to vector<2x32xf32>
    %226 = math.tanh %225 : vector<2x32xf32>
    %227 = vector.extract_strided_slice %218 {offsets = [0, 96], sizes = [2, 32], strides = [1, 1]} : vector<2x128xf32> to vector<2x32xf32>
    %228 = arith.negf %227 : vector<2x32xf32>
    %229 = math.exp %228 : vector<2x32xf32>
    %cst_129 = arith.constant 1.000000e+00 : f32
    %230 = vector.broadcast %cst_129 : f32 to vector<2x32xf32>
    %231 = arith.addf %230, %229 : vector<2x32xf32>
    %232 = arith.divf %230, %231 : vector<2x32xf32>
    %233 = arith.mulf %224, %226 : vector<2x32xf32>
    %234 = math.tanh %233 : vector<2x32xf32>
    %235 = arith.mulf %232, %234 : vector<2x32xf32>
    %c656 = arith.constant 656 : index
    %c0_130 = arith.constant 0 : index
    %236 = vector.load %arg2[%c656, %c0_130] : memref<760x192xf32, #tpu.memory_space<vmem>>, vector<32x32xf32>
    %cst_131 = arith.constant dense<0.000000e+00> : vector<2x32xf32>
    %237 = tpu.matmul %235, %236, %cst_131 {dimension_numbers = #tpu.dot_dimension_numbers<[1], [0], [0], [1], [0, 0, 1, 1], [], []>} : vector<2x32xf32>, vector<32x32xf32>, vector<2x32xf32> -> vector<2x32xf32>
    %c688 = arith.constant 688 : index
    %c0_132 = arith.constant 0 : index
    %238 = vector.load %arg2[%c688, %c0_132] : memref<760x192xf32, #tpu.memory_space<vmem>>, vector<1x32xf32>
    %239 = vector.broadcast %238 : vector<1x32xf32> to vector<2x32xf32>
    %240 = arith.addf %237, %239 : vector<2x32xf32>
    %241 = arith.addf %240, %235 : vector<2x32xf32>
    %c696 = arith.constant 696 : index
    %c0_133 = arith.constant 0 : index
    %242 = vector.load %arg2[%c696, %c0_133] : memref<760x192xf32, #tpu.memory_space<vmem>>, vector<32x16xf32>
    %cst_134 = arith.constant dense<0.000000e+00> : vector<2x16xf32>
    %243 = tpu.matmul %241, %242, %cst_134 {dimension_numbers = #tpu.dot_dimension_numbers<[1], [0], [0], [1], [0, 0, 1, 1], [], []>} : vector<2x32xf32>, vector<32x16xf32>, vector<2x16xf32> -> vector<2x16xf32>
    %c728 = arith.constant 728 : index
    %c0_135 = arith.constant 0 : index
    %244 = vector.load %arg2[%c728, %c0_135] : memref<760x192xf32, #tpu.memory_space<vmem>>, vector<1x16xf32>
    %245 = vector.broadcast %244 : vector<1x16xf32> to vector<2x16xf32>
    %246 = arith.addf %243, %245 : vector<2x16xf32>
    %cst_136 = arith.constant 0.000000e+00 : f32
    %247 = vector.broadcast %cst_136 : f32 to vector<2x16xf32>
    %248 = arith.maximumf %246, %247 : vector<2x16xf32>
    %c736 = arith.constant 736 : index
    %c0_137 = arith.constant 0 : index
    %249 = vector.load %arg2[%c736, %c0_137] : memref<760x192xf32, #tpu.memory_space<vmem>>, vector<16x128xf32>
    %cst_138 = arith.constant dense<0.000000e+00> : vector<2x128xf32>
    %250 = tpu.matmul %248, %249, %cst_138 {dimension_numbers = #tpu.dot_dimension_numbers<[1], [0], [0], [1], [0, 0, 1, 1], [], []>} : vector<2x16xf32>, vector<16x128xf32>, vector<2x128xf32> -> vector<2x128xf32>
    %c752 = arith.constant 752 : index
    %c0_139 = arith.constant 0 : index
    %251 = vector.load %arg2[%c752, %c0_139] : memref<760x192xf32, #tpu.memory_space<vmem>>, vector<1x128xf32>
    %252 = vector.broadcast %251 : vector<1x128xf32> to vector<2x128xf32>
    %253 = arith.addf %250, %252 : vector<2x128xf32>
    %c0_140 = arith.constant 0 : index
    %c0_141 = arith.constant 0 : index
    %254 = vector.load %arg3[%c0_140, %c0_141] : memref<2x128xf32, #tpu.memory_space<vmem>>, vector<2x128xf32>
    tpu.vector_store %arg3[%c0_140, %c0_141], %253 {strides = array<i32>} : memref<2x128xf32, #tpu.memory_space<vmem>>, vector<2x128xf32>,
    return
  }
}

</mosaic_0001>

<bundles_post_ra>
// kernel: cnn_lstm_forward.1
= control target key start
LH: loop header
LB: loop body
LE: loop exit
PB: predicated region body
PF: predicated region fallthrough
CT: control target
= control target key end

     0   :  { %vm55_vm0 = vcmask 1043456   ;;  %vm15_vm1 = vcmask 31744   ;;  %v4417_v3 = vmov 0.0   ;;  %vm18_vm2 = vcmask 27648   ;;  %s5123_s0 = inlined_call_operand.vmem [shape: f32[2,16,4], index: 0, kind: input, shape index: {}]   ;;  %s5124_s1 = inlined_call_operand.vmem [shape: f32[2,8], index: 1, kind: input, shape index: {}]   ;;  %s5125_s2 = inlined_call_operand.vmem [shape: f32[760,192], index: 2, kind: input, shape index: {}]   ;;  %s5126_s3 = inlined_call_operand.hbm [shape: f32[2,128], index: 3, kind: output, shape index: {}]  }
   0x1   :  { %v40_v0 = vld [vmem:[%s5125_s2] sm:$0xf0]  ;;  %16 = vst.msk [vmem:[#allocation2] sm:$0xff] %vm15_vm1, %v4417_v3  ;;  %17 = vst.msk [vmem:[#allocation2 + $0x8] sm:$0xff] %vm15_vm1, %v4417_v3  ;;  %v24_v4 = vld [vmem:[%s5123_s0 + $0x8] sm:$0xff] }
   0x2   :  { %v23_v1 = vld [vmem:[%s5123_s0] sm:$0xff]  ;;  %v42_v2 = vrot.slane %v40_v0, 4  ;;  %20 = vst.msk [vmem:[#allocation2 + $0x18] sm:$0xff] %vm15_vm1, %v4417_v3  ;;  %21 = vst.msk [vmem:[#allocation2 + $0x20] sm:$0xff] %vm15_vm1, %v4417_v3  ;;  %v25_v5 = vld [vmem:[%s5123_s0 + $0x10] sm:$0xff] }
   0x3   :  { %27 = vst.msk [vmem:[#allocation2 + $0x2] sm:$0xff] %vm15_vm1, %v23_v1  ;;  %v35_v6 = vld [vmem:[%s5125_s2] sm:$0xf]  ;;  %29 = vst.msk [vmem:[#allocation2 + $0x1a] sm:$0xff] %vm15_vm1, %v25_v5  ;;  %v26_v7 = vld [vmem:[%s5123_s0 + $0x18] sm:$0xff] }
   0x4   :  { %19 = vst.msk [vmem:[#allocation2 + $0x10] sm:$0xf] %vm18_vm2, %v4417_v3  ;;  %22 = vst.msk [vmem:[#allocation2 + $0x28] sm:$0xf] %vm18_vm2, %v4417_v3  ;;  %3842 = vmatprep.subr.msk.mxu0 %vm55_vm0, %v42_v2 }
   0x5   :  { %28 = vst.msk [vmem:[#allocation2 + $0xa] sm:$0xff] %vm15_vm1, %v24_v4  ;;  %30 = vst.msk [vmem:[#allocation2 + $0x22] sm:$0xff] %vm15_vm1, %v26_v7 }
   0x6   :  { %8 = vsyncpa [#allocation7], 0  ;;  %3843 = vmatpush3.msk.msra.mxu0 %vm55_vm0, %v42_v2  ;;  %v247_v11 = vld [vmem:[%s5125_s2 + $0x10] sm:$0xf]  ;;  %v356_v14 = vld [vmem:[%s5125_s2 + $0x10] sm:$0xf0] }
   0x7   :  { %3850 = vmatprep.subr.msk.mxu0 %vm55_vm0, %v35_v6  ;;  %v358_v17 = vrot.slane %v356_v14, 4  ;;  %v466_v22 = vld [vmem:[%s5125_s2 + $0x20] sm:$0xf]  ;;  %vm580_vm3 = vcmask 261120   ;;  %vm595_vm4 = vcmask 257024   ;;  %v610_v33 = vld [vmem:[%s5125_s2 + $0x90] sm:$0xff] }
   0x8   :  { %594 = vst.msk [vmem:[#allocation4] sm:$0xff] %vm580_vm3, %v4417_v3  ;;  %597 = vst.msk [vmem:[#allocation4 + $0x10] sm:$0xff] %vm580_vm3, %v4417_v3  ;;  %v609_v32 = vld [vmem:[%s5125_s2 + $0x80] sm:$0xff]  ;;  %v612_v36 = vld [vmem:[%s5125_s2 + $0xb0] sm:$0xff]  ;;  %vm1047_vm5 = vcmask 523264   ;;  %vm4418_vm6 = vmmov 0  }
   0x9   :  { %596 = vst.msk [vmem:[#allocation4 + $0x8] sm:$0xf] %vm595_vm4, %v4417_v3  ;;  %598 = vst.msk [vmem:[#allocation4 + $0x18] sm:$0xf] %vm595_vm4, %v4417_v3  ;;  %v4166_v34 = vpack.c.bf16 %v610_v33, %v609_v32  ;;  %v611_v35 = vld [vmem:[%s5125_s2 + $0xa0] sm:$0xff]  ;;  %v604_v39 = vld [vmem:[%s5125_s2 + $0x50] sm:$0xff] }
   0xa   :  { %v36_v8 = vld [vmem:[#allocation2 + $0x1] sm:$0xff]  ;;  %v38_v9 = vld [vmem:[#allocation2 + $0x19] sm:$0xff]  ;;  %v4170_v37 = vpack.c.bf16 %v612_v36, %v611_v35  ;;  %v571_v41 = vld [vmem:[%s5125_s2 + $0x30] ss:$0 sm:$0xff]  ;;  %s4419_s24 = smov 64   ;;  %vm1163_vm7 = vcmask 130048  }
   0xb   :  { %3844 = vmatprep.mubr.msk.f32.mxu0 %vm15_vm1, %v36_v8  ;;  %v31_v13 = vld [vmem:[#allocation2] sm:$0xff]  ;;  %v33_v16 = vld [vmem:[#allocation2 + $0x18] sm:$0xff]  ;;  %4167 = vmatprep.subr.bf16.mxu1 %v4166_v34  ;;  %v606_v62 = vld [vmem:[%s5125_s2 + $0x70] sm:$0xff]  ;;  %s4420_s25 = smov 48   ;;  %s4421_s0 = smov 112   ;;  %vm2800_vm8 = vcmask 64512  }
   0xc   :  { %v37_v10 = vld [vmem:[#allocation2 + $0x9] sm:$0xff]  ;;  %v39_v12 = vld [vmem:[#allocation2 + $0x21] sm:$0xff]  ;;  %4169 = vmatpush3.bf16.msra.mxu1 %v4166_v34  ;;  %v1059_v34 = vld [vmem:[%s5125_s2 + $0x1b8] sm:$0xff]  ;;  %s4422_s26 = smov 32   ;;  %s4424_s27 = smov 96   ;;  %vm2890_vm9 = vcmask 1041409  }
   0xd   :  { %3845 = vmatmul.mubr.msk.f32.vlgmr.msra.gmra.mrb[0].mxu0 %vm15_vm1, %v37_v10  ;;  %v32_v15 = vld [vmem:[#allocation2 + $0x8] sm:$0xff]  ;;  %v34_v18 = vld [vmem:[#allocation2 + $0x20] sm:$0xff]  ;;  %4171 = vmatprep.subr.bf16.mxu1 %v4170_v37  ;;  %v778_v2 = vld [vmem:[%s5125_s2 + $0xd0] sm:$0xff]  ;;  %s4425_s9 = smov 16   ;;  %s4426_s10 = smov 80  }
   0xe   :  { %3851 = vmatpush3.msk.msra.mxu0 %vm55_vm0, %v35_v6  ;;  %3847 = vmatprep.mubr.msk.f32.mxu0 %vm15_vm1, %v38_v9  ;;  %v243_v19 = vld [vmem:[#allocation2 + $0x2] sm:$0xff]  ;;  %v244_v20 = vld [vmem:[#allocation2 + $0xa] sm:$0xff]  ;;  %v245_v21 = vld [vmem:[#allocation2 + $0x1a] sm:$0xff]  ;;  %s4427_s20 = smov [#allocation6]  }
   0xf   :  { %3858 = vmatprep.subr.msk.mxu0 %vm55_vm0, %v247_v11  ;;  %v246_v23 = vld [vmem:[#allocation2 + $0x22] sm:$0xff]  ;;  %v353_v25 = vld [vmem:[#allocation2 + $0xb] sm:$0xff]  ;;  %s3595_s21 = sshll.u32 %s4427_s20, 4  ;;  %s3596_s21 = int_to_ptr.vmem [resolvable:$true] %s3595_s21 }
  0x10   :  { %v352_v24 = vld [vmem:[#allocation2 + $0x3] sm:$0xff]  ;;  %v354_v26 = vld [vmem:[#allocation2 + $0x1b] sm:$0xff]  ;;  %v463_v29 = vld [vmem:[#allocation2 + $0xc] sm:$0xff]  ;;  %4173 = vmatpush3.bf16.msra.mxu1 %v4170_v37  ;;  %s4393_s22 = scalar_lea.vmem %s3596_s21, 32  ;;  %p4398_p1 = scmp.lt.s32.totalorder %s3596_s21, %s3596_s21 }
  0x11   :  { %3848 = vmatmul.mubr.msk.f32.gmra.mrb[2].mxu0 %vm15_vm1, %v39_v12  ;;  %v355_v27 = vld [vmem:[#allocation2 + $0x23] sm:$0xff]  ;;  %v780_v7 = vld [vmem:[%s5125_s2 + $0xf0] sm:$0xff]  ;;  %p4394_p0 = scmp.ne.s32.totalorder %s3596_s21, %s4393_s22  ;;  %p4399_p2 = scmp.lt.s32.totalorder %s4393_s22, %s4393_s22 }
  0x12   :  { %3852 = vmatprep.mubr.msk.f32.mxu0 %vm15_vm1, %v31_v13  ;;  %v462_v28 = vld [vmem:[#allocation2 + $0x4] sm:$0xff]  ;;  %v464_v30 = vld [vmem:[#allocation2 + $0x1c] sm:$0xff]  ;;  %v1058_v37 = vld [vmem:[%s5125_s2 + $0x1b0] sm:$0xff] }
  0x13   :  { %v465_v31 = vld [vmem:[#allocation2 + $0x24] sm:$0xff]  ;;  %p4400_p3 = por %p4399_p2, %p4398_p1 }
  0x14   :  { %v603_v38 = vld [vmem:[%s5125_s2 + $0x40] sm:$0xff]  ;;  %v1061_v35 = vld [vmem:[%s5125_s2 + $0x1c8] sm:$0xff] }
  0x15   :  { %3853 = vmatmul.mubr.msk.f32.vlgmr.msra.gmra.mrb[0].mxu0 %vm15_vm1, %v32_v15  ;;  %v4174_v40 = vpack.c.bf16 %v604_v39, %v603_v38  ;;  %v605_v61 = vld [vmem:[%s5125_s2 + $0x60] sm:$0xff]  ;;  %v869_v15 = vld [vmem:[%s5125_s2 + $0x130] sm:$0xff]  ;;  %v4210_v36 = vpack.c.bf16 %v1061_v35, %v1059_v34  ;;  %p4401_p4 = pnand %p4400_p3, %p4394_p0 }
  0x16   :  { %3859 = vmatpush3.msk.msra.mxu0 %vm55_vm0, %v247_v11  ;;  %3855 = vmatprep.mubr.msk.f32.mxu0 %vm15_vm1, %v33_v16  ;;  %v4178_v63 = vpack.c.bf16 %v606_v62, %v605_v61  ;;  %v777_v1 = vld [vmem:[%s5125_s2 + $0xc0] sm:$0xff]  ;;  %v867_v11 = vld [vmem:[%s5125_s2 + $0x110] sm:$0xff]  ;;  %v1073_v62 = vlaneseq }
  0x17   :  { %3866 = vmatprep.subr.msk.mxu0 %vm55_vm0, %v358_v17  ;;  %4175 = vmatprep.subr.bf16.mxu1 %v4174_v40  ;;  %v4182_v5 = vpack.c.bf16 %v778_v2, %v777_v1  ;;  %v779_v6 = vld [vmem:[%s5125_s2 + $0xe0] sm:$0xff]  ;;  %v3638_v1 = vld [vmem:[%s5125_s2 + $0x210] ss:$8 sm:$0x3] }
  0x18   :  { %v4186_v8 = vpack.c.bf16 %v780_v7, %v779_v6  ;;  %v866_v10 = vld [vmem:[%s5125_s2 + $0x100] sm:$0xff] }
  0x19   :  { %3856 = vmatmul.mubr.msk.f32.gmra.mrb[2].mxu0 %vm15_vm1, %v34_v18  ;;  %v4190_v13 = vpack.c.bf16 %v867_v11, %v866_v10  ;;  %v868_v14 = vld [vmem:[%s5125_s2 + $0x120] sm:$0xff] }
  0x1a   :  { %3860 = vmatprep.mubr.msk.f32.mxu0 %vm15_vm1, %v243_v19  ;;  %v4194_v16 = vpack.c.bf16 %v869_v15, %v868_v14  ;;  %v955_v18 = vld [vmem:[%s5125_s2 + $0x140] sm:$0xff]  ;;  %v956_v19 = vld [vmem:[%s5125_s2 + $0x150] sm:$0xff] }
  0x1b   :  { %v1056_v32 = vld [vmem:[%s5125_s2 + $0x1a0] sm:$0xff] }
  0x1c   :  { %v1060_v38 = vld [vmem:[%s5125_s2 + $0x1c0] sm:$0xff] }
  0x1d   :  { %3861 = vmatmul.mubr.msk.f32.vlgmr.msra.gmra.mrb[0].mxu0 %vm15_vm1, %v244_v20  ;;  %v4212_v39 = vpack.c.bf16 %v1060_v38, %v1058_v37 }
  0x1e   :  { %3867 = vmatpush3.msk.msra.mxu0 %vm55_vm0, %v358_v17  ;;  %3863 = vmatprep.mubr.msk.f32.mxu0 %vm15_vm1, %v245_v21  ;;  %v4198_v21 = vpack.c.bf16 %v956_v19, %v955_v18 }
  0x1f   :  { %3874 = vmatprep.subr.msk.mxu0 %vm55_vm0, %v466_v22 }
  0x21   :  { %3864 = vmatmul.mubr.msk.f32.gmra.mrb[2].mxu0 %vm15_vm1, %v246_v23  ;;  %v958_v23 = vld [vmem:[%s5125_s2 + $0x170] sm:$0xff] }
  0x22   :  { %3868 = vmatprep.mubr.msk.f32.mxu0 %vm15_vm1, %v352_v24 }
  0x25   :  { %3869 = vmatmul.mubr.msk.f32.vlgmr.msra.gmra.mrb[0].mxu0 %vm15_vm1, %v353_v25 }
  0x26   :  { %3875 = vmatpush3.msk.msra.mxu0 %vm55_vm0, %v466_v22  ;;  %3871 = vmatprep.mubr.msk.f32.mxu0 %vm15_vm1, %v354_v26  ;;  %v957_v22 = vld [vmem:[%s5125_s2 + $0x160] sm:$0xff] }
  0x27   :  { %v4202_v24 = vpack.c.bf16 %v958_v23, %v957_v22 }
  0x29   :  { %3872 = vmatmul.mubr.msk.f32.gmra.mrb[2].mxu0 %vm15_vm1, %v355_v27 }
  0x2a   :  { %3876 = vmatprep.mubr.msk.f32.mxu0 %vm15_vm1, %v462_v28  ;;  %v1055_v28 = vld [vmem:[%s5125_s2 + $0x198] sm:$0xff] }
  0x2d   :  { %3877 = vmatmul.mubr.msk.f32.vlgmr.msra.gmra.mrb[0].mxu0 %vm15_vm1, %v463_v29  ;;  %v1057_v29 = vld [vmem:[%s5125_s2 + $0x1a8] sm:$0xff] }
  0x2e   :  { %3879 = vmatprep.mubr.msk.f32.mxu0 %vm15_vm1, %v464_v30  ;;  %v4206_v30 = vpack.c.bf16 %v1057_v29, %v1055_v28 }
  0x30   :  { %4207 = vmatprep.subr.bf16.mxu0 %v4206_v30 }
  0x31   :  { %3880 = vmatmul.mubr.msk.f32.gmra.mrb[2].mxu0 %vm15_vm1, %v465_v31  ;;  %v1054_v31 = vld [vmem:[%s5125_s2 + $0x190] sm:$0xff] }
  0x32   :  { %1150 = vmatprep.mubr.f32.mxu0 %v4417_v3  ;;  %v4208_v33 = vpack.c.bf16 %v1056_v32, %v1054_v31 }
  0x34   :  { %4209 = vmatpush1.bf16.msra.mxu0 %v4208_v33 }
  0x35   :  { %4211 = vmatprep.subr.bf16.mxu0 %v4210_v36 }
  0x38   :  { %4213 = vmatpush1.bf16.msra.mxu0 %v4212_v39 }
 0x100   :  { %v3878_v42 = vpop.f32.mrb[0].mxu0 }
 0x101   :  { %v573_v43 = vadd.f32 %v3878_v42, %v571_v41  ;;  %v548_v44 = vpop.f32.mrb[1].mxu0  ;;  %v1062_v42 = vld [vmem:[%s5125_s2 + $0x1d0] sm:$0xff] }
 0x102   :  { %v572_v45 = vadd.f32 %v571_v41, %v548_v44  ;;  %v1064_v44 = vld [vmem:[%s5125_s2 + $0x1e0] sm:$0xff] }
 0x103   :  { %v577_v46 = vmax.f32 %v573_v43, 0.0 }
 0x104   :  { %v576_v47 = vmax.f32 %v572_v45, 0.0  ;;  %v3881_v48 = vpop.f32.mrb[2].mxu0  ;;  %v1067_v45 = vld [vmem:[%s5125_s2 + $0x1f8] sm:$0xff] }
 0x105   :  { %582 = vst.msk [vmem:[#allocation3 + $0x8] sm:$0xff] %vm580_vm3, %v577_v46  ;;  %v575_v49 = vadd.f32 %v3881_v48, %v571_v41  ;;  %v558_v50 = vpop.f32.mrb[3].mxu0  ;;  %v1069_v46 = vld [vmem:[%s5125_s2 + $0x208] sm:$0xff] }
 0x106   :  { %581 = vst.msk [vmem:[#allocation3] sm:$0xff] %vm580_vm3, %v576_v47  ;;  %v574_v51 = vadd.f32 %v571_v41, %v558_v50  ;;  %v1065_v41 = vld [vmem:[%s5125_s2 + $0x1e8] sm:$0xff]  ;;  %v4216_v47 = vpack.c.bf16 %v1064_v44, %v1062_v42  ;;  %v4218_v48 = vpack.c.bf16 %v1069_v46, %v1067_v45  ;;  %v1068_v50 = vld [vmem:[%s5125_s2 + $0x200] sm:$0xff] }
 0x107   :  { %v579_v52 = vmax.f32 %v575_v49, 0.0  ;;  %v1066_v49 = vld [vmem:[%s5125_s2 + $0x1f0] sm:$0xff] }
 0x108   :  { %v578_v53 = vmax.f32 %v574_v51, 0.0  ;;  %v4220_v51 = vpack.c.bf16 %v1068_v50, %v1066_v49 }
 0x109   :  { %584 = vst.msk [vmem:[#allocation3 + $0x18] sm:$0xff] %vm580_vm3, %v579_v52  ;;  %v1042_v52 = vld [vmem:[%s5125_s2 + $0x180] ss:$0 sm:$0xff] }
 0x10a   :  { %583 = vst.msk [vmem:[#allocation3 + $0x10] sm:$0xff] %vm580_vm3, %v578_v53 }
 0x10d   :  { %v585_v54 = vld [vmem:[#allocation3] ss:$2 sm:$0xff]  ;;  %v589_v55 = vld [vmem:[#allocation3 + $0x1] ss:$2 sm:$0xff] }
 0x10e   :  { %v592_v56 = vmax.f32 %v585_v54, %v589_v55 }
 0x110   :  { %599 = vst.msk [vmem:[#allocation4 + $0x2] sm:$0xff] %vm580_vm3, %v592_v56 }
 0x111   :  { %v587_v57 = vld [vmem:[#allocation3 + $0x10] ss:$2 sm:$0xff]  ;;  %v591_v58 = vld [vmem:[#allocation3 + $0x11] ss:$2 sm:$0xff] }
 0x112   :  { %v593_v59 = vmax.f32 %v587_v57, %v591_v58 }
 0x114   :  { %600 = vst.msk [vmem:[#allocation4 + $0x12] sm:$0xff] %vm580_vm3, %v593_v59 }
 0x117   :  { %v607_v60 = vld [vmem:[#allocation4 + $0x1] sm:$0xff] }
 0x118   :  { %3890 = vmatprep.mubr.msk.f32.mxu1 %vm580_vm3, %v607_v60  ;;  %v601_v4 = vld [vmem:[#allocation4] sm:$0xff] }
 0x119   :  { %v775_v12 = vld [vmem:[#allocation4 + $0x2] sm:$0xff] }
 0x11a   :  { %v864_v20 = vld [vmem:[#allocation4 + $0x3] sm:$0xff] }
 0x11b   :  { %v608_v0 = vld [vmem:[#allocation4 + $0x11] sm:$0xff]  ;;  %v953_v26 = vld [vmem:[#allocation4 + $0x4] sm:$0xff] }
 0x11c   :  { %3891 = vmatmul.mubr.msk.f32.vlgmr.msra.gmra.mrb[0].mxu1 %vm580_vm3, %v608_v0  ;;  %v602_v9 = vld [vmem:[#allocation4 + $0x10] sm:$0xff] }
 0x11d   :  { %4177 = vmatpush3.bf16.msra.mxu1 %v4174_v40  ;;  %3901 = vmatprep.mubr.msk.f32.mxu1 %vm580_vm3, %v601_v4  ;;  %v776_v17 = vld [vmem:[#allocation4 + $0x12] sm:$0xff]  ;;  %v1063_v40 = vld [vmem:[%s5125_s2 + $0x1d8] sm:$0xff] }
 0x11e   :  { %4179 = vmatprep.subr.bf16.mxu1 %v4178_v63  ;;  %v865_v25 = vld [vmem:[#allocation4 + $0x13] sm:$0xff]  ;;  %v4214_v43 = vpack.c.bf16 %v1065_v41, %v1063_v40 }
 0x11f   :  { %v954_v27 = vld [vmem:[#allocation4 + $0x14] sm:$0xff] }
 0x120   :  { %4215 = vmatprep.subr.bf16.mxu0 %v4214_v43 }
 0x121   :  { %4181 = vmatpush3.bf16.msra.mxu1 %v4178_v63  ;;  %4217 = vmatpush1.bf16.msra.mxu0 %v4216_v47  ;;  %v4666_v63 = vshrl.u32 %v1073_v62, 7 }
 0x122   :  { %4183 = vmatprep.subr.bf16.mxu1 %v4182_v5  ;;  %4219 = vmatprep.subr.bf16.mxu0 %v4218_v48 }
 0x123   :  { %v4673_v0 = vsub.s32 0, %v4666_v63 }
 0x124   :  { %3902 = vmatmul.mubr.msk.f32.vlgmr.msra.gmra.mrb[0].mxu1 %vm580_vm3, %v602_v9 }
 0x125   :  { %4185 = vmatpush3.bf16.msra.mxu1 %v4182_v5  ;;  %3912 = vmatprep.mubr.msk.f32.mxu1 %vm580_vm3, %v775_v12  ;;  %v1076_v2 = vrot.slane %v3638_v1, %v4673_v0 }
 0x126   :  { %4187 = vmatprep.subr.bf16.mxu1 %v4186_v8  ;;  %4221 = vmatpush1.bf16.msra.mxu0 %v4220_v51 }
 0x127   :  { %3937 = vmatprep.subr.mxu0 %v4417_v3 }
 0x129   :  { %4189 = vmatpush3.bf16.msra.mxu1 %v4186_v8  ;;  %v4690_v8 = vsub.s32 1, %v4666_v63 }
 0x12a   :  { %4191 = vmatprep.subr.bf16.mxu1 %v4190_v13 }
 0x12b   :  { %v1080_v9 = vrot.slane %v3638_v1, %v4690_v8  ;;  %v4423_v1 = vmov 0.0|0.0  }
 0x12c   :  { %3913 = vmatmul.mubr.msk.f32.vlgmr.msra.gmra.mrb[0].mxu1 %vm580_vm3, %v776_v17 }
 0x12d   :  { %4193 = vmatpush3.bf16.msra.mxu1 %v4190_v13  ;;  %3923 = vmatprep.mubr.msk.f32.mxu1 %vm580_vm3, %v864_v20 }
 0x12e   :  { %4195 = vmatprep.subr.bf16.mxu1 %v4194_v16 }
 0x131   :  { %4197 = vmatpush3.bf16.msra.mxu1 %v4194_v16 }
 0x132   :  { %4199 = vmatprep.subr.bf16.mxu1 %v4198_v21 }
 0x134   :  { %3924 = vmatmul.mubr.msk.f32.vlgmr.msra.gmra.mrb[0].mxu1 %vm580_vm3, %v865_v25 }
 0x135   :  { %4201 = vmatpush3.bf16.msra.mxu1 %v4198_v21  ;;  %3934 = vmatprep.mubr.msk.f32.mxu1 %vm580_vm3, %v953_v26 }
 0x136   :  { %4203 = vmatprep.subr.bf16.mxu1 %v4202_v24 }
 0x139   :  { %4205 = vmatpush3.bf16.msra.mxu1 %v4202_v24 }
 0x13a   :  { %3942 = vmatprep.subr.mxu1 %v4417_v3 }
 0x13c   :  { %3935 = vmatmul.mubr.msk.f32.vlgmr.msra.gmra.mrb[0].mxu1 %vm580_vm3, %v954_v27 }
 0x13d   :  { %3944 = vmatprep.mubr.msk.f32.mxu1 %vm4418_vm6, %v4417_v3 }
 0x20f   :  { %v3936_v53 = vpop.f32.mrb[0].mxu1 }
 0x210   :  { %v1044_v54 = vadd.f32 %v3936_v53, %v1042_v52  ;;  %v1031_v55 = vpop.f32.mrb[1].mxu1 }
 0x211   :  { %v1043_v56 = vadd.f32 %v1042_v52, %v1031_v55 }
 0x212   :  { %v1046_v57 = vmax.f32 %v1044_v54, 0.0 }
 0x213   :  { %v1045_v58 = vmax.f32 %v1043_v56, 0.0 }
 0x214   :  { %1049 = vst.msk [vmem:[#allocation5 + $0x8] sm:$0xff] %vm1047_vm5, %v1046_v57 }
 0x215   :  { %1048 = vst.msk [vmem:[#allocation5] sm:$0xff] %vm1047_vm5, %v1045_v58 }
 0x21c   :  { %v1050_v59 = vld [vmem:[#allocation5] ss:$2 sm:$0xff]  ;;  %v1052_v60 = vld [vmem:[#allocation5 + $0x1] ss:$2 sm:$0xff] }
 0x21d   :  { %v4662_v61 = vmax.f32 %v1050_v59, %v1052_v60 }
 0x21f   :  { %3639 = vmatmul.mubr.msk.f32.vlgmr.msra.gmra.mrb[4].mxu0 %vm1047_vm5, %v4662_v61 }
 0x220   :  { %3939 = vmatprep.mubr.msk.f32.mxu0 %vm4418_vm6, %v4417_v3 }
 0x2f2   :  { %v1152_v4 = vpop.f32.mrb[4].mxu0 }
 0x2f3   :  { %v4679_v5 = vadd.f32 %v1152_v4, %v1076_v2  ;;  %v1154_v6 = vpop.f32.mrb[5].mxu0 }
 0x2f4   :  { %v4693_v10 = vadd.f32 %v1154_v6, %v1080_v9  ;;  %v1820_v9 = vld [vmem:[%s5125_s2 + $0x240] sm:$0xff] }
 0x2f5   :  { %1161 = vrot.lane.b32.xlu0 %v4679_v5, %s4419_s24  ;;  %v4685_v7 = vcombine.high %v4679_v5, %v4679_v5 }
 0x2f6   :  { %v4699_v12 = vcombine.high %v4693_v10, %v4693_v10 }
 0x2f9   :  { %1238 = vrot.lane.b32.xlu0 %v4685_v7, %s4419_s24 }
 0x367   :  { %v1162_v11 = vpop.permute.xlu0 %1161 }
 0x368   :  { %3938 = vmatpush3.xpose.msk.msra.mxu0 %vm1163_vm7, %v1162_v11  ;;  %v1821_v11 = vld [vmem:[%s5125_s2 + $0x250] sm:$0xff] }
 0x369   :  { %3952 = vmatprep.subr.mxu0 %v4417_v3 }
 0x36b   :  { %3940 = vmatmul.mubr.msk.f32.vlgmr.msra.gmra.mrb[6].mxu0 %vm1163_vm7, %v4679_v5  ;;  %v1239_v13 = vpop.permute.xlu0 %1238 }
 0x36c   :  { %3943 = vmatpush3.xpose.msk.msra.mxu1 %vm1163_vm7, %v1239_v13  ;;  %3953 = vmatpush3.msk.msra.mxu0 %vm55_vm0, %v4699_v12 }
 0x36d   :  { %3947 = vmatprep.subr.mxu1 %v4417_v3  ;;  %3954 = vmatprep.mubr.msk.f32.mxu0 %vm4418_vm6, %v4417_v3 }
 0x36e   :  { %3962 = vmatprep.subr.mxu0 %v4417_v3 }
 0x36f   :  { %3945 = vmatmul.mubr.msk.f32.vlgmr.msra.gmra.mrb[2].mxu1 %vm1163_vm7, %v4685_v7 }
 0x370   :  { %3948 = vmatpush3.msk.msra.mxu1 %vm55_vm0, %v4693_v10  ;;  %3949 = vmatprep.mubr.msk.f32.mxu1 %vm4418_vm6, %v4417_v3 }
 0x371   :  { %3957 = vmatprep.subr.mxu1 %v4417_v3 }
 0x43e   :  { %v1234_v14 = vpop.f32.mrb[6].mxu0 }
 0x43f   :  { %v3941_v15 = vpop.f32.mrb[7].mxu0  ;;  %v1314_v16 = vsel %vm18_vm2, %v1234_v14, -inf }
 0x440   :  { %1315 = vmax.xlane.f32.xlu1 %v1314_v16  ;;  %v1486_v16 = vld [vmem:[%s5125_s2 + $0x220] sm:$0xff] }
 0x442   :  { %v1310_v17 = vpop.f32.mrb[2].mxu1 }
 0x443   :  { %v3946_v18 = vpop.f32.mrb[3].mxu1  ;;  %v1317_v19 = vsel %vm18_vm2, %v1310_v17, -inf }
 0x444   :  { %1318 = vmax.xlane.f32.xlu1 %v1317_v19 }
 0x455   :  { %1490 = vrot.lane.b32.xlu1 %v4679_v5, %s4420_s25 }
 0x459   :  { %1568 = vrot.lane.b32.xlu1 %v4685_v7, %s4420_s25 }
 0x45d   :  { %1488 = vrot.lane.b32.xlu1 %v4679_v5, %s4421_s0 }
 0x4cd   :  { %v1316_v20 = vpop.xlane.xlu1 %1315 }
 0x4ce   :  { %v1320_v21 = vsub.f32 %v1234_v14, %v1316_v20  ;;  %v4223_v14 = vpack.c.bf16 %v1821_v11, %v1820_v9  ;;  %v2305_v9 = vld [vmem:[%s5125_s2 + $0x270] sm:$0xff] }
 0x4d0   :  { %v1322_v22 = vmul.f32 1.442695, %v1320_v21 }
 0x4d1   :  { %v1319_v23 = vpop.xlane.xlu1 %1318 }
 0x4d2   :  { %4345 = vpow2.f32 %v1322_v22  ;;  %v1321_v24 = vsub.f32 %v1310_v17, %v1319_v23  ;;  %v1487_v17 = vld [vmem:[%s5125_s2 + $0x230] sm:$0xff] }
 0x4d3   :  { %v4226_v19 = vpack.c.bf16 %v1487_v17, %v1486_v16 }
 0x4d4   :  { %v1324_v25 = vmul.f32 1.442695, %v1321_v24 }
 0x4d5   :  { %v1491_v30 = vpop.permute.xlu1 %1490 }
 0x4d6   :  { %4347 = vpow2.f32 %v1324_v25 }
 0x4d9   :  { %v1569_v31 = vpop.permute.xlu1 %1568 }
 0x4dc   :  { %v4346_v26 = vpop.eup %4345 }
 0x4dd   :  { %v1326_v27 = vsel %vm18_vm2, %v4346_v26, 0.0  ;;  %v1489_v32 = vpop.permute.xlu1 %1488 }
 0x4de   :  { %1327 = vadd.xlane.f32.xlu0 %v1326_v27 }
 0x4e0   :  { %v4348_v28 = vpop.eup %4347 }
 0x4e1   :  { %v1329_v29 = vsel %vm18_vm2, %v4348_v28, 0.0 }
 0x4e2   :  { %1330 = vadd.xlane.f32.xlu1 %v1329_v29 }
 0x4f3   :  { %1566 = vrot.lane.b32.xlu1 %v4685_v7, %s4421_s0 }
 0x56b   :  { %v1328_v33 = vpop.xlane.xlu0 %1327 }
 0x56c   :  { %4349 = vrcp.f32 %v1328_v33 }
 0x56f   :  { %v1331_v34 = vpop.xlane.xlu1 %1330 }
 0x570   :  { %4351 = vrcp.f32 %v1331_v34 }
 0x573   :  { %v1567_v39 = vpop.permute.xlu1 %1566 }
 0x576   :  { %v4350_v35 = vpop.eup %4349 }
 0x577   :  { %v1334_v36 = vmul.f32 %v4350_v35, %v4346_v26 }
 0x579   :  { %3950 = vmatmul.mubr.msk.f32.vlgmr.msra.gmra.mrb[4].mxu1 %vm15_vm1, %v1334_v36 }
 0x57a   :  { %v4352_v37 = vpop.eup %4351  ;;  %3958 = vmatpush3.xpose.msk.msra.mxu1 %vm1163_vm7, %v1491_v30  ;;  %3959 = vmatprep.mubr.msk.f32.mxu1 %vm4418_vm6, %v4417_v3 }
 0x57b   :  { %v1335_v38 = vmul.f32 %v4352_v37, %v4348_v28  ;;  %3967 = vmatprep.subr.mxu1 %v4417_v3 }
 0x57d   :  { %3955 = vmatmul.mubr.msk.f32.vlgmr.msra.gmra.mrb[8].mxu0 %vm15_vm1, %v1335_v38  ;;  %3960 = vmatmul.mubr.msk.f32.vlgmr.msra.gmra.mrb[6].mxu1 %vm1163_vm7, %v1489_v32 }
 0x57e   :  { %3963 = vmatpush3.xpose.msk.msra.mxu0 %vm1163_vm7, %v1569_v31  ;;  %3964 = vmatprep.mubr.msk.f32.mxu0 %vm4418_vm6, %v4417_v3 }
 0x57f   :  { %3972 = vmatprep.subr.mxu0 %v4417_v3  ;;  %3969 = vmatprep.mubr.msk.f32.mxu1 %vm4418_vm6, %v4417_v3 }
 0x581   :  { %3965 = vmatmul.mubr.msk.f32.vlgmr.msra.gmra.mrb[10].mxu0 %vm1163_vm7, %v1567_v39 }
 0x582   :  { %3974 = vmatprep.mubr.msk.f32.mxu0 %vm4418_vm6, %v4417_v3 }
 0x64c   :  { %v4743_v40 = vpop.f32.mrb[4].mxu1 }
 0x64d   :  { %v3951_v41 = vpop.f32.mrb[5].mxu1 }
 0x650   :  { %v4745_v42 = vpop.f32.mrb[8].mxu0  ;;  %v1562_v43 = vpop.f32.mrb[6].mxu1 }
 0x651   :  { %v1899_v44 = vcombine.low %v4743_v40, %v4745_v42  ;;  %v3956_v45 = vpop.f32.mrb[9].mxu0  ;;  %v3961_v46 = vpop.f32.mrb[7].mxu1  ;;  %v1644_v47 = vsel %vm18_vm2, %v1562_v43, -inf }
 0x652   :  { %1645 = vmax.xlane.f32.xlu0 %v1644_v47 }
 0x654   :  { %v1640_v48 = vpop.f32.mrb[10].mxu0 }
 0x655   :  { %v3966_v49 = vpop.f32.mrb[11].mxu0  ;;  %v1647_v50 = vsel %vm18_vm2, %v1640_v48, -inf }
 0x656   :  { %1648 = vmax.xlane.f32.xlu1 %v1647_v50 }
 0x667   :  { %2052 = vrot.lane.b32.xlu1 %v4685_v7, %s4422_s26 }
 0x668   :  { %1666 = vrot.lane.b32.xlu0 %v4693_v10, %s4421_s0 }
 0x6df   :  { %v1646_v51 = vpop.xlane.xlu0 %1645 }
 0x6e0   :  { %v1650_v52 = vsub.f32 %v1562_v43, %v1646_v51 }
 0x6e2   :  { %v1652_v53 = vmul.f32 1.442695, %v1650_v52 }
 0x6e3   :  { %v1649_v54 = vpop.xlane.xlu1 %1648  ;;  %v1667_v55 = vpop.permute.xlu0 %1666 }
 0x6e4   :  { %4353 = vpow2.f32 %v1652_v53  ;;  %v1651_v56 = vsub.f32 %v1640_v48, %v1649_v54  ;;  %3968 = vmatpush3.msk.msra.mxu1 %vm55_vm0, %v1667_v55 }
 0x6e5   :  { %4222 = vmatprep.subr.bf16.mxu1 %v4423_v1 }
 0x6e6   :  { %v1654_v57 = vmul.f32 1.442695, %v1651_v56 }
 0x6e7   :  { %v2053_v23 = vpop.permute.xlu1 %2052 }
 0x6e8   :  { %4355 = vpow2.f32 %v1654_v57 }
 0x6ee   :  { %v4354_v58 = vpop.eup %4353 }
 0x6ef   :  { %v1656_v59 = vsel %vm18_vm2, %v4354_v58, 0.0 }
 0x6f0   :  { %1657 = vadd.xlane.f32.xlu0 %v1656_v59 }
 0x6f2   :  { %v4356_v60 = vpop.eup %4355 }
 0x6f3   :  { %v1659_v62 = vsel %vm18_vm2, %v4356_v60, 0.0 }
 0x6f4   :  { %1660 = vadd.xlane.f32.xlu0 %v1659_v62 }
 0x70a   :  { %1743 = vrot.lane.b32.xlu0 %v4699_v12, %s4421_s0 }
 0x70e   :  { %1974 = vrot.lane.b32.xlu0 %v4679_v5, %s4422_s26 }
 0x712   :  { %1972 = vrot.lane.b32.xlu0 %v4679_v5, %s4424_s27 }
 0x716   :  { %2050 = vrot.lane.b32.xlu0 %v4685_v7, %s4424_s27 }
 0x77d   :  { %v1658_v2 = vpop.xlane.xlu0 %1657 }
 0x77e   :  { %4357 = vrcp.f32 %v1658_v2 }
 0x781   :  { %v1661_v4 = vpop.xlane.xlu0 %1660 }
 0x782   :  { %4359 = vrcp.f32 %v1661_v4 }
 0x785   :  { %v1744_v6 = vpop.permute.xlu0 %1743 }
 0x786   :  { %3973 = vmatpush3.msk.msra.mxu0 %vm55_vm0, %v1744_v6  ;;  %v2304_v6 = vld [vmem:[%s5125_s2 + $0x260] sm:$0xff] }
 0x787   :  { %4225 = vmatprep.subr.bf16.mxu0 %v4423_v1  ;;  %v4229_v11 = vpack.c.bf16 %v2305_v9, %v2304_v6  ;;  %v2879_v6 = vld [vmem:[%s5125_s2 + $0x300] sm:$0xff] }
 0x788   :  { %v4358_v13 = vpop.eup %4357 }
 0x789   :  { %v1664_v15 = vmul.f32 %v4358_v13, %v4354_v58  ;;  %v1975_v21 = vpop.permute.xlu0 %1974 }
 0x78b   :  { %3970 = vmatmul.mubr.msk.f32.vlgmr.msra.gmra.mrb[8].mxu1 %vm15_vm1, %v1664_v15 }
 0x78c   :  { %v4360_v18 = vpop.eup %4359  ;;  %4224 = vmatpush3.bf16.msra.mxu1 %v4223_v14  ;;  %3981 = vmatprep.mubr.msk.f32.mxu1 %vm4418_vm6, %v4417_v3 }
 0x78d   :  { %v1665_v20 = vmul.f32 %v4360_v18, %v4356_v60  ;;  %3991 = vmatprep.subr.mxu1 %v4417_v3  ;;  %v1973_v22 = vpop.permute.xlu0 %1972 }
 0x78f   :  { %3975 = vmatmul.mubr.msk.f32.vlgmr.msra.gmra.mrb[12].mxu0 %vm15_vm1, %v1665_v20 }
 0x790   :  { %4227 = vmatpush3.bf16.msra.mxu0 %v4226_v19  ;;  %3988 = vmatprep.mubr.msk.f32.mxu0 %vm4418_vm6, %v4417_v3 }
 0x791   :  { %3996 = vmatprep.subr.mxu0 %v4417_v3  ;;  %v2051_v24 = vpop.permute.xlu0 %2050 }
 0x793   :  { %3989 = vmatmul.mubr.msk.f32.vlgmr.msra.gmra.mrb[14].mxu0 %vm1163_vm7, %v1899_v44 }
 0x794   :  { %3998 = vmatprep.mubr.msk.f32.mxu0 %vm4418_vm6, %v4417_v3 }
 0x799   :  { %3997 = vmatpush3.xpose.msk.msra.mxu0 %vm1163_vm7, %v2053_v23 }
 0x79a   :  { %4006 = vmatprep.subr.mxu0 %v4417_v3 }
 0x79c   :  { %3999 = vmatmul.mubr.msk.f32.vlgmr.msra.gmra.mrb[16].mxu0 %vm1163_vm7, %v2051_v24 }
 0x79d   :  { %4008 = vmatprep.mubr.msk.f32.mxu0 %vm4418_vm6, %v4417_v3 }
 0x85e   :  { %v1739_v25 = vpop.f32.mrb[8].mxu1 }
 0x85f   :  { %v3971_v26 = vpop.f32.mrb[9].mxu1 }
 0x862   :  { %v1816_v27 = vpop.f32.mrb[12].mxu0 }
 0x863   :  { %v1824_v28 = vcombine.low %v1739_v25, %v1816_v27  ;;  %v3976_v29 = vpop.f32.mrb[13].mxu0 }
 0x865   :  { %3982 = vmatmul.mubr.msk.f32.vlgmr.msra.gmra.mrb[10].mxu1 %vm1163_vm7, %v1824_v28 }
 0x866   :  { %3992 = vmatpush3.xpose.msk.msra.mxu1 %vm1163_vm7, %v1975_v21  ;;  %v1968_v30 = vpop.f32.mrb[14].mxu0  ;;  %3993 = vmatprep.mubr.msk.f32.mxu1 %vm4418_vm6, %v4417_v3 }
 0x867   :  { %v3990_v31 = vpop.f32.mrb[15].mxu0  ;;  %4001 = vmatprep.subr.mxu1 %v4417_v3 }
 0x869   :  { %3994 = vmatmul.mubr.msk.f32.vlgmr.msra.gmra.mrb[12].mxu1 %vm1163_vm7, %v1973_v22 }
 0x86a   :  { %4003 = vmatprep.mubr.msk.f32.mxu1 %vm4418_vm6, %v4417_v3 }
 0x86f   :  { %v2124_v32 = vpop.f32.mrb[16].mxu0 }
 0x870   :  { %v4000_v33 = vpop.f32.mrb[17].mxu0  ;;  %v2131_v34 = vsel %vm18_vm2, %v2124_v32, -inf }
 0x871   :  { %2132 = vmax.xlane.f32.xlu1 %v2131_v34 }
 0x882   :  { %2227 = vrot.lane.b32.xlu1 %v4699_v12, %s4424_s27 }
 0x886   :  { %2384 = vrot.lane.b32.xlu1 %v4679_v5, %s4425_s9 }
 0x88a   :  { %2382 = vrot.lane.b32.xlu1 %v4679_v5, %s4426_s10 }
 0x8fe   :  { %v2133_v35 = vpop.xlane.xlu1 %2132 }
 0x8ff   :  { %v2135_v37 = vsub.f32 %v2124_v32, %v2133_v35 }
 0x901   :  { %v2138_v38 = vmul.f32 1.442695, %v2135_v37 }
 0x902   :  { %v2228_v36 = vpop.permute.xlu1 %2227 }
 0x903   :  { %4007 = vmatpush3.msk.msra.mxu0 %vm55_vm0, %v2228_v36  ;;  %4361 = vpow2.f32 %v2138_v38 }
 0x904   :  { %4018 = vmatprep.subr.mxu0 %v4417_v3 }
 0x906   :  { %v2385_v52 = vpop.permute.xlu1 %2384 }
 0x90a   :  { %v2383_v55 = vpop.permute.xlu1 %2382 }
 0x90d   :  { %v4362_v45 = vpop.eup %4361 }
 0x90e   :  { %v2143_v5 = vsel %vm18_vm2, %v4362_v45, 0.0 }
 0x938   :  { %v1893_v39 = vpop.f32.mrb[10].mxu1 }
 0x939   :  { %v4814_v40 = vadd.f32 %v1968_v30, %v1893_v39  ;;  %v3983_v41 = vpop.f32.mrb[11].mxu1 }
 0x93c   :  { %v2046_v42 = vpop.f32.mrb[12].mxu1 }
 0x93d   :  { %v3995_v43 = vpop.f32.mrb[13].mxu1  ;;  %v2128_v44 = vsel %vm18_vm2, %v2046_v42, -inf }
 0x93e   :  { %2129 = vmax.xlane.f32.xlu0 %v2128_v44  ;;  %v2715_v43 = vld [vmem:[%s5125_s2 + $0x290] sm:$0xff] }
 0x942   :  { %2144 = vadd.xlane.f32.xlu0 %v2143_v5  ;;  %v2797_v5 = vld [vmem:[%s5124_s1] sm:$0x3] }
 0x9cb   :  { %v2130_v46 = vpop.xlane.xlu0 %2129 }
 0x9cc   :  { %v2134_v47 = vsub.f32 %v2046_v42, %v2130_v46  ;;  %v2965_v46 = vld [vmem:[%s5125_s2 + $0x330] sm:$0xff] }
 0x9ce   :  { %v2136_v48 = vmul.f32 1.442695, %v2134_v47  ;;  %v2966_v47 = vld [vmem:[%s5125_s2 + $0x340] sm:$0xff] }
 0x9cf   :  { %v2145_v49 = vpop.xlane.xlu0 %2144 }
 0x9d0   :  { %4363 = vpow2.f32 %v2136_v48  ;;  %v4247_v48 = vpack.c.bf16 %v2966_v47, %v2965_v46  ;;  %v3148_v46 = vld [vmem:[%s5125_s2 + $0x460] sm:$0xff] }
 0x9d1   :  { %4365 = vrcp.f32 %v2145_v49  ;;  %v2874_v49 = vld [vmem:[%s5125_s2 + $0x2b0] sm:$0xff] }
 0x9da   :  { %v4364_v50 = vpop.eup %4363 }
 0x9db   :  { %v4366_v51 = vpop.eup %4365  ;;  %v2140_v53 = vsel %vm18_vm2, %v4364_v50, 0.0 }
 0x9dc   :  { %v2149_v54 = vmul.f32 %v4366_v51, %v4362_v45  ;;  %2141 = vadd.xlane.f32.xlu0 %v2140_v53  ;;  %v2798_v45 = vld [vmem:[%s5125_s2 + $0x4b0] sm:$0xff] }
 0x9de   :  { %4009 = vmatmul.mubr.msk.f32.vlgmr.msra.gmra.mrb[18].mxu0 %vm15_vm1, %v2149_v54 }
 0x9df   :  { %4019 = vmatpush3.xpose.msk.msra.mxu0 %vm1163_vm7, %v2385_v52  ;;  %4020 = vmatprep.mubr.msk.f32.mxu0 %vm4418_vm6, %v4417_v3 }
 0x9e0   :  { %4028 = vmatprep.subr.mxu0 %v4417_v3 }
 0x9e2   :  { %4021 = vmatmul.mubr.msk.f32.vlgmr.msra.gmra.mrb[20].mxu0 %vm1163_vm7, %v2383_v55  ;;  %v2967_v55 = vld [vmem:[%s5125_s2 + $0x350] sm:$0xff] }
 0x9e3   :  { %4030 = vmatprep.mubr.msk.f32.mxu0 %vm4418_vm6, %v4417_v3 }
 0x9f2   :  { %2150 = vrot.lane.b32.xlu0 %v4693_v10, %s4424_s27 }
 0x9f6   :  { %2462 = vrot.lane.b32.xlu0 %v4685_v7, %s4425_s9 }
 0x9fa   :  { %2460 = vrot.lane.b32.xlu0 %v4685_v7, %s4426_s10 }
 0xa69   :  { %v2142_v56 = vpop.xlane.xlu0 %2141 }
 0xa6a   :  { %4367 = vrcp.f32 %v2142_v56  ;;  %v2968_v56 = vld [vmem:[%s5125_s2 + $0x360] sm:$0xff] }
 0xa6d   :  { %v2151_v57 = vpop.permute.xlu0 %2150 }
 0xa6e   :  { %4002 = vmatpush3.msk.msra.mxu1 %vm55_vm0, %v2151_v57  ;;  %v4250_v57 = vpack.c.bf16 %v2968_v56, %v2967_v55  ;;  %v3155_v55 = vsub.s32 3, %v4666_v63 }
 0xa6f   :  { %4228 = vmatprep.subr.bf16.mxu1 %v4423_v1 }
 0xa71   :  { %v2463_v13 = vpop.permute.xlu0 %2462 }
 0xa74   :  { %v4368_v58 = vpop.eup %4367 }
 0xa75   :  { %v2148_v59 = vmul.f32 %v4368_v58, %v4364_v50  ;;  %v2461_v17 = vpop.permute.xlu0 %2460  ;;  %v2875_v50 = vld [vmem:[%s5125_s2 + $0x2c0] sm:$0xff]  ;;  %v2876_v58 = vld [vmem:[%s5125_s2 + $0x2d0] sm:$0xff] }
 0xa76   :  { %v4235_v52 = vpack.c.bf16 %v2875_v50, %v2874_v49  ;;  %v3149_v49 = vld [vmem:[%s5125_s2 + $0x470] sm:$0xff]  ;;  %v3150_v50 = vld [vmem:[%s5125_s2 + $0x480] sm:$0xff] }
 0xa77   :  { %4004 = vmatmul.mubr.msk.f32.vlgmr.msra.gmra.mrb[14].mxu1 %vm15_vm1, %v2148_v59  ;;  %v2877_v59 = vld [vmem:[%s5125_s2 + $0x2e0] sm:$0xff] }
 0xa78   :  { %4015 = vmatprep.mubr.msk.f32.mxu1 %vm4418_vm6, %v4417_v3  ;;  %4230 = vmatpush3.bf16.msra.mxu1 %v4229_v11  ;;  %v2971_v11 = vld [vmem:[%s5125_s2 + $0x390] sm:$0xff] }
 0xa79   :  { %4023 = vmatprep.subr.mxu1 %v4417_v3 }
 0xab1   :  { %v2300_v60 = vpop.f32.mrb[18].mxu0 }
 0xab2   :  { %v4010_v62 = vpop.f32.mrb[19].mxu0 }
 0xab3   :  { %v2969_v62 = vld [vmem:[%s5125_s2 + $0x370] sm:$0xff] }
 0xab5   :  { %v2456_v2 = vpop.f32.mrb[20].mxu0 }
 0xab6   :  { %v4022_v4 = vpop.f32.mrb[21].mxu0  ;;  %v2538_v7 = vsel %vm18_vm2, %v2456_v2, -inf }
 0xab7   :  { %2539 = vmax.xlane.f32.xlu1 %v2538_v7  ;;  %v2878_v7 = vld [vmem:[%s5125_s2 + $0x2f0] sm:$0xff] }
 0xab8   :  { %v4241_v9 = vpack.c.bf16 %v2879_v6, %v2878_v7 }
 0xb44   :  { %v2540_v18 = vpop.xlane.xlu1 %2539 }
 0xb45   :  { %v2544_v19 = vsub.f32 %v2456_v2, %v2540_v18  ;;  %v2970_v2 = vld [vmem:[%s5125_s2 + $0x380] sm:$0xff] }
 0xb46   :  { %v4253_v4 = vpack.c.bf16 %v2970_v2, %v2969_v62 }
 0xb47   :  { %v2546_v20 = vmul.f32 1.442695, %v2544_v19 }
 0xb49   :  { %4369 = vpow2.f32 %v2546_v20 }
 0xb4a   :  { %v2223_v14 = vpop.f32.mrb[14].mxu1 }
 0xb4b   :  { %v2308_v15 = vcombine.low %v2223_v14, %v2300_v60  ;;  %v4005_v16 = vpop.f32.mrb[15].mxu1  ;;  %v4238_v60 = vpack.c.bf16 %v2877_v59, %v2876_v58  ;;  %v2880_v14 = vld [vmem:[%s5125_s2 + $0x310] sm:$0xff]  ;;  %v2799_v59 = vld [vmem:[%s5125_s2 + $0x4c0] ss:$0 sm:$0xff] }
 0xb4c   :  { %v2881_v16 = vld [vmem:[%s5125_s2 + $0x320] sm:$0xff] }
 0xb4d   :  { %4016 = vmatmul.mubr.msk.f32.vlgmr.msra.gmra.mrb[16].mxu1 %vm1163_vm7, %v2308_v15 }
 0xb4e   :  { %4024 = vmatpush3.xpose.msk.msra.mxu1 %vm1163_vm7, %v2463_v13  ;;  %4025 = vmatprep.mubr.msk.f32.mxu1 %vm4418_vm6, %v4417_v3  ;;  %v2972_v13 = vld [vmem:[%s5125_s2 + $0x3a0] sm:$0xff] }
 0xb4f   :  { %4033 = vmatprep.subr.mxu1 %v4417_v3  ;;  %v4256_v15 = vpack.c.bf16 %v2972_v13, %v2971_v11 }
 0xb51   :  { %4026 = vmatmul.mubr.msk.f32.vlgmr.msra.gmra.mrb[18].mxu1 %vm1163_vm7, %v2461_v17  ;;  %v4244_v17 = vpack.c.bf16 %v2881_v16, %v2880_v14 }
 0xb52   :  { %4035 = vmatprep.mubr.msk.f32.mxu1 %vm4418_vm6, %v4417_v3 }
 0xb53   :  { %v4370_v27 = vpop.eup %4369 }
 0xb54   :  { %v2550_v28 = vsel %vm18_vm2, %v4370_v27, 0.0 }
 0xc20   :  { %v2377_v21 = vpop.f32.mrb[16].mxu1 }
 0xc21   :  { %v4855_v22 = vadd.f32 %v2377_v21, %v4814_v40  ;;  %v4017_v23 = vpop.f32.mrb[17].mxu1  ;;  %v2792_v21 = vld [vmem:[%s5125_s2 + $0x2a0] ss:$0 sm:$0xff] }
 0xc24   :  { %v2534_v24 = vpop.f32.mrb[18].mxu1 }
 0xc25   :  { %v4027_v25 = vpop.f32.mrb[19].mxu1  ;;  %v2541_v26 = vsel %vm18_vm2, %v2534_v24, -inf }
 0xc26   :  { %2542 = vmax.xlane.f32.xlu0 %v2541_v26 }
 0xc2a   :  { %2551 = vadd.xlane.f32.xlu0 %v2550_v28  ;;  %v3056_v28 = vld [vmem:[%s5125_s2 + $0x3c0] sm:$0xff] }
 0xc40   :  { %2560 = vrot.lane.b32.xlu0 %v4693_v10, %s4426_s10 }
 0xcb3   :  { %v2543_v29 = vpop.xlane.xlu0 %2542 }
 0xcb4   :  { %v2545_v30 = vsub.f32 %v2534_v24, %v2543_v29 }
 0xcb6   :  { %v2548_v31 = vmul.f32 1.442695, %v2545_v30 }
 0xcb7   :  { %v2552_v32 = vpop.xlane.xlu0 %2551 }
 0xcb8   :  { %4371 = vpow2.f32 %v2548_v31 }
 0xcb9   :  { %4373 = vrcp.f32 %v2552_v32 }
 0xcbb   :  { %v2561_v33 = vpop.permute.xlu0 %2560 }
 0xcbc   :  { %4029 = vmatpush3.msk.msra.mxu0 %vm55_vm0, %v2561_v33 }
 0xcbd   :  { %4231 = vmatprep.subr.bf16.mxu0 %v4423_v1 }
 0xcc2   :  { %v4372_v34 = vpop.eup %4371 }
 0xcc3   :  { %v4374_v35 = vpop.eup %4373  ;;  %v2553_v36 = vsel %vm18_vm2, %v4372_v34, 0.0 }
 0xcc4   :  { %v2558_v37 = vmul.f32 %v4374_v35, %v4370_v27  ;;  %2554 = vadd.xlane.f32.xlu1 %v2553_v36  ;;  %v3055_v27 = vld [vmem:[%s5125_s2 + $0x3b0] sm:$0xff] }
 0xcc5   :  { %v4259_v30 = vpack.c.bf16 %v3056_v28, %v3055_v27 }
 0xcc6   :  { %4031 = vmatmul.mubr.msk.f32.vlgmr.msra.gmra.mrb[22].mxu0 %vm15_vm1, %v2558_v37  ;;  %v3060_v37 = vld [vmem:[%s5125_s2 + $0x400] sm:$0xff] }
 0xcc7   :  { %4042 = vmatprep.mubr.msk.f32.mxu0 %vm4418_vm6, %v4417_v3 }
 0xcd5   :  { %2637 = vrot.lane.b32.xlu1 %v4699_v12, %s4426_s10  ;;  %v2714_v12 = vld [vmem:[%s5125_s2 + $0x280] sm:$0xff] }
 0xcd6   :  { %v4232_v44 = vpack.c.bf16 %v2715_v43, %v2714_v12  ;;  %v3146_v12 = vld [vmem:[%s5125_s2 + $0x440] sm:$0xff] }
 0xcd8   :  { %4233 = vmatpush3.bf16.msra.mxu0 %v4232_v44 }
 0xcd9   :  { %4234 = vmatprep.subr.bf16.mxu0 %v4423_v1 }
 0xd51   :  { %v2555_v10 = vpop.xlane.xlu1 %2554 }
 0xd52   :  { %4375 = vrcp.f32 %v2555_v10 }
 0xd55   :  { %v2638_v38 = vpop.permute.xlu1 %2637 }
 0xd56   :  { %4034 = vmatpush3.msk.msra.mxu1 %vm55_vm0, %v2638_v38  ;;  %v3061_v38 = vld [vmem:[%s5125_s2 + $0x410] sm:$0xff] }
 0xd57   :  { %4045 = vmatprep.subr.mxu1 %v4417_v3 }
 0xd5c   :  { %v4376_v39 = vpop.eup %4375 }
 0xd5d   :  { %v2559_v40 = vmul.f32 %v4376_v39, %v4372_v34  ;;  %v3058_v34 = vld [vmem:[%s5125_s2 + $0x3e0] sm:$0xff] }
 0xd5e   :  { %v3062_v39 = vld [vmem:[%s5125_s2 + $0x420] sm:$0xff] }
 0xd5f   :  { %4036 = vmatmul.mubr.msk.f32.vlgmr.msra.gmra.mrb[20].mxu1 %vm15_vm1, %v2559_v40  ;;  %v4268_v40 = vpack.c.bf16 %v3062_v39, %v3061_v38  ;;  %v3354_v39 = vld [vmem:[%s5125_s2 + $0x550] sm:$0xff] }
 0xd60   :  { %4047 = vmatprep.mubr.msk.f32.mxu1 %vm4418_vm6, %v4417_v3  ;;  %4046 = vmatpush3.msra.mxu1 %v2798_v45 }
 0xd61   :  { %4246 = vmatprep.subr.bf16.mxu1 %v4423_v1 }
 0xd63   :  { %4048 = vmatmul.mubr.msk.f32.vlgmr.msra.gmra.mrb[22].mxu1 %vm2800_vm8, %v2797_v5  ;;  %v3147_v5 = vld [vmem:[%s5125_s2 + $0x450] sm:$0xff] }
 0xd64   :  { %4085 = vmatprep.mubr.msk.f32.mxu1 %vm4418_vm6, %v4417_v3  ;;  %4248 = vmatpush3.bf16.msra.mxu1 %v4247_v48  ;;  %v4274_v48 = vpack.c.bf16 %v3148_v46, %v3147_v5  ;;  %v3435_v46 = vld [vmem:[%s5125_s2 + $0x590] sm:$0xff] }
 0xd65   :  { %4249 = vmatprep.subr.bf16.mxu1 %v4423_v1 }
 0xd68   :  { %4251 = vmatpush3.bf16.msra.mxu1 %v4250_v57 }
 0xd69   :  { %4252 = vmatprep.subr.bf16.mxu1 %v4423_v1 }
 0xd6c   :  { %4254 = vmatpush3.bf16.msra.mxu1 %v4253_v4 }
 0xd6d   :  { %4255 = vmatprep.subr.bf16.mxu1 %v4423_v1 }
 0xd70   :  { %4257 = vmatpush3.bf16.msra.mxu1 %v4256_v15 }
 0xd71   :  { %4258 = vmatprep.subr.bf16.mxu1 %v4423_v1 }
 0xd99   :  { %v2633_v41 = vpop.f32.mrb[22].mxu0 }
 0xd9a   :  { %v4032_v42 = vpop.f32.mrb[23].mxu0 }
 0xd9b   :  { %v3145_v42 = vld [vmem:[%s5125_s2 + $0x430] sm:$0xff] }
 0xd9c   :  { %v4271_v45 = vpack.c.bf16 %v3146_v12, %v3145_v42 }
 0xe32   :  { %v2710_v51 = vpop.f32.mrb[20].mxu1 }
 0xe33   :  { %v2718_v53 = vcombine.low %v2633_v41, %v2710_v51  ;;  %v4037_v54 = vpop.f32.mrb[21].mxu1  ;;  %v3065_v41 = vsub.s32 2, %v4666_v63  ;;  %v4277_v51 = vpack.c.bf16 %v3150_v50, %v3149_v49  ;;  %v3355_v49 = vld [vmem:[%s5125_s2 + $0x560] ss:$0 sm:$0xff] }
 0xe35   :  { %4043 = vmatmul.mubr.msk.f32.vlgmr.msra.gmra.mrb[24].mxu0 %vm1163_vm7, %v2718_v53  ;;  %v3152_v53 = vld [vmem:[%s5125_s2 + $0x4a0] sm:$0xff] }
 0xe36   :  { %4236 = vmatpush3.bf16.msra.mxu0 %v4235_v52  ;;  %4066 = vmatprep.mubr.msk.f32.mxu0 %vm4418_vm6, %v4417_v3  ;;  %v4949_v18 = vpop.f32.mrb[22].mxu1  ;;  %v3151_v52 = vld [vmem:[%s5125_s2 + $0x490] sm:$0xff] }
 0xe37   :  { %4237 = vmatprep.subr.bf16.mxu0 %v4423_v1  ;;  %v4049_v19 = vpop.f32.mrb[23].mxu1  ;;  %v4280_v54 = vpack.c.bf16 %v3152_v53, %v3151_v52 }
 0xe38   :  { %v3254_v19 = vld [vmem:[%s5125_s2 + $0x4e0] sm:$0xff] }
 0xe3a   :  { %4239 = vmatpush3.bf16.msra.mxu0 %v4238_v60  ;;  %v2871_v60 = vadd.f32 %v4949_v18, %v2799_v59  ;;  %v3253_v18 = vld [vmem:[%s5125_s2 + $0x4d0] sm:$0xff] }
 0xe3b   :  { %4240 = vmatprep.subr.bf16.mxu0 %v4423_v1 }
 0xe3e   :  { %4242 = vmatpush3.bf16.msra.mxu0 %v4241_v9 }
 0xe3f   :  { %4243 = vmatprep.subr.bf16.mxu0 %v4423_v1 }
 0xe42   :  { %4245 = vmatpush3.bf16.msra.mxu0 %v4244_v17 }
 0xe43   :  { %4282 = vmatprep.subr.bf16.mxu0 %v4423_v1 }
 0xf08   :  { %v2787_v20 = vpop.f32.mrb[24].mxu0 }
 0xf09   :  { %v2791_v23 = vadd.f32 %v2787_v20, %v4855_v22  ;;  %v4044_v24 = vpop.f32.mrb[25].mxu0  ;;  %v3255_v20 = vld [vmem:[%s5125_s2 + $0x4f0] sm:$0xff] }
 0xf0b   :  { %v2793_v25 = vadd.f32 %v2792_v21, %v2791_v23  ;;  %v4283_v21 = vpack.c.bf16 %v3254_v19, %v3253_v18  ;;  %v3256_v23 = vld [vmem:[%s5125_s2 + $0x500] sm:$0xff] }
 0xf0c   :  { %v4286_v24 = vpack.c.bf16 %v3256_v23, %v3255_v20 }
 0xf0d   :  { %v2794_v26 = vadd.f32 %v2793_v25, %v4662_v61  ;;  %v3057_v61 = vld [vmem:[%s5125_s2 + $0x3d0] sm:$0xff] }
 0xf0f   :  { %v2796_v29 = vcombine.high %v2794_v26, %v2794_v26  ;;  %v2885_v31 = vrot.slane %v2794_v26, %v4673_v0  ;;  %v2976_v22 = vrot.slane %v2794_v26, %v4690_v8  ;;  %v3066_v44 = vrot.slane %v2794_v26, %v3065_v41 }
 0xf10   :  { %v3156_v57 = vrot.slane %v2794_v26, %v3155_v55 }
 0xf11   :  { %v2889_v32 = vrot.slane %v2796_v29, %v4673_v0  ;;  %v2980_v33 = vrot.slane %v2796_v29, %v4690_v8  ;;  %v4262_v0 = vpack.c.bf16 %v3058_v34, %v3057_v61  ;;  %v3059_v8 = vld [vmem:[%s5125_s2 + $0x3f0] sm:$0xff]  ;;  %v3070_v43 = vrot.slane %v2796_v29, %v3065_v41 }
 0xf12   :  { %v4265_v10 = vpack.c.bf16 %v3060_v37, %v3059_v8  ;;  %v3160_v56 = vrot.slane %v2796_v29, %v3155_v55  ;;  %v3257_v29 = vld [vmem:[%s5125_s2 + $0x510] ss:$0 sm:$0xff]  ;;  %v3351_v8 = vld [vmem:[%s5125_s2 + $0x520] sm:$0xff] }
 0xf13   :  { %v2891_v35 = vsel %vm2890_vm9, %v2889_v32, %v2885_v31  ;;  %v2981_v36 = vsel %vm2890_vm9, %v2980_v33, %v2976_v22  ;;  %v3071_v47 = vsel %vm2890_vm9, %v3070_v43, %v3066_v44  ;;  %v3352_v37 = vld [vmem:[%s5125_s2 + $0x530] sm:$0xff]  ;;  %v3434_v44 = vld [vmem:[%s5125_s2 + $0x580] sm:$0xff] }
 0xf14   :  { %4067 = vmatmul.mubr.msk.f32.vlgmr.msra.gmra.mrb[26].mxu0 %vm1047_vm5, %v2891_v35  ;;  %4086 = vmatmul.mubr.msk.f32.vlgmr.msra.gmra.mrb[24].mxu1 %vm1047_vm5, %v2981_v36  ;;  %v3161_v58 = vsel %vm2890_vm9, %v3160_v56, %v3156_v57  ;;  %v4289_v38 = vpack.c.bf16 %v3352_v37, %v3351_v8  ;;  %v3433_v43 = vld [vmem:[%s5125_s2 + $0x570] sm:$0xff] }
 0xf15   :  { %4260 = vmatpush3.bf16.msra.mxu1 %v4259_v30  ;;  %4104 = vmatprep.mubr.msk.f32.mxu1 %vm4418_vm6, %v4417_v3  ;;  %v3437_v56 = vld [vmem:[%s5125_s2 + $0x5b0] ss:$0 sm:$0xff] }
 0xf16   :  { %4261 = vmatprep.subr.bf16.mxu1 %v4423_v1  ;;  %4134 = vmatprep.mubr.msk.f32.mxu0 %vm4418_vm6, %v4417_v3 }
 0xf17   :  { %4284 = vmatpush3.bf16.msra.mxu0 %v4283_v21 }
 0xf18   :  { %4285 = vmatprep.subr.bf16.mxu0 %v4423_v1 }
 0xf19   :  { %4263 = vmatpush3.bf16.msra.mxu1 %v4262_v0 }
 0xf1a   :  { %4264 = vmatprep.subr.bf16.mxu1 %v4423_v1 }
 0xf1b   :  { %4287 = vmatpush3.bf16.msra.mxu0 %v4286_v24 }
 0xf1c   :  { %4288 = vmatprep.subr.bf16.mxu0 %v4423_v1 }
 0xf1d   :  { %4266 = vmatpush3.bf16.msra.mxu1 %v4265_v10  ;;  %v3353_v10 = vld [vmem:[%s5125_s2 + $0x540] sm:$0xff] }
 0xf1e   :  { %4267 = vmatprep.subr.bf16.mxu1 %v4423_v1 }
 0xf21   :  { %4269 = vmatpush3.bf16.msra.mxu1 %v4268_v40  ;;  %v4292_v40 = vpack.c.bf16 %v3354_v39, %v3353_v10 }
 0xf22   :  { %4270 = vmatprep.subr.bf16.mxu1 %v4423_v1 }
 0xf24   :  { %4105 = vmatmul.mubr.msk.f32.vlgmr.msra.gmra.mrb[24].mxu1 %vm1047_vm5, %v3071_v47  ;;  %v3436_v47 = vld [vmem:[%s5125_s2 + $0x5a0] sm:$0xff] }
 0xf25   :  { %4272 = vmatpush3.bf16.msra.mxu1 %v4271_v45  ;;  %4123 = vmatprep.mubr.msk.f32.mxu1 %vm4418_vm6, %v4417_v3  ;;  %v4295_v45 = vpack.c.bf16 %v3434_v44, %v3433_v43 }
 0xf26   :  { %4273 = vmatprep.subr.bf16.mxu1 %v4423_v1 }
 0xf29   :  { %4275 = vmatpush3.bf16.msra.mxu1 %v4274_v48  ;;  %v4298_v48 = vpack.c.bf16 %v3436_v47, %v3435_v46 }
 0xf2a   :  { %4276 = vmatprep.subr.bf16.mxu1 %v4423_v1 }
 0xf2d   :  { %4278 = vmatpush3.bf16.msra.mxu1 %v4277_v51 }
 0xf2e   :  { %4279 = vmatprep.subr.bf16.mxu1 %v4423_v1 }
 0xf31   :  { %4281 = vmatpush3.bf16.msra.mxu1 %v4280_v54  ;;  %v3512_v54 = vld [vmem:[%s5125_s2 + $0x5c0] sm:$0xff] }
 0xf34   :  { %4124 = vmatmul.mubr.msk.f32.vlgmr.msra.gmra.mrb[24].mxu1 %vm1047_vm5, %v3161_v58 }
 0xfe7   :  { %v2960_v62 = vpop.f32.mrb[26].mxu0 }
 0xfe8   :  { %v2964_v2 = vadd.f32 %v2960_v62, %v2871_v60  ;;  %v4068_v4 = vpop.f32.mrb[27].mxu0 }
0x1007   :  { %v3230_v7 = vpop.f32.mrb[24].mxu1 }
0x1008   :  { %v4305_v63 = vadd.f32 %v3230_v7, %v2964_v2  ;;  %v4125_v6 = vpop.f32.mrb[25].mxu1 }
0x100a   :  { %4377 = vtanh.f32 %v4305_v63  ;;  %v3681_v11 = vmul.f32 -1.442695, %v4305_v63 }
0x100c   :  { %4379 = vpow2.f32 %v3681_v11 }
0x1014   :  { %v4378_v9 = vpop.eup %4377 }
0x1015   :  { %3243 = vrot.lane.b32.xlu1 %v4378_v9, %s4419_s24 }
0x1016   :  { %v4380_v13 = vpop.eup %4379 }
0x1017   :  { %v3238_v14 = vadd.f32 1.0, %v4380_v13 }
0x1019   :  { %4381 = vrcp.f32 %v3238_v14 }
0x1023   :  { %v4382_v15 = vpop.eup %4381 }
0x1087   :  { %v3244_v16 = vpop.permute.xlu1 %3243 }
0x1088   :  { %v3246_v17 = vmul.f32 %v4382_v15, %v3244_v16 }
0x108a   :  { %4383 = vtanh.f32 %v3246_v17 }
0x1094   :  { %v4384_v25 = vpop.eup %4383 }
0x1095   :  { %3249 = vrot.lane.b32.xlu0 %v4384_v25, %s4424_s27 }
0x1107   :  { %v3250_v26 = vpop.permute.xlu0 %3249 }
0x1108   :  { %v3252_v27 = vmul.f32 %v4382_v15, %v3250_v26 }
0x110a   :  { %3259 = vrot.lane.b32.xlu1 %v3252_v27, %s4422_s26 }
0x117c   :  { %v3260_v28 = vpop.permute.xlu1 %3259 }
0x117d   :  { %4135 = vmatmul.mubr.msk.f32.vlgmr.msra.gmra.mrb[28].mxu0 %vm580_vm3, %v3260_v28 }
0x117e   :  { %4145 = vmatprep.mubr.msk.f32.mxu0 %vm4418_vm6, %v4417_v3  ;;  %4290 = vmatpush3.bf16.msra.mxu0 %v4289_v38 }
0x117f   :  { %4291 = vmatprep.subr.bf16.mxu0 %v4423_v1 }
0x1182   :  { %4293 = vmatpush3.bf16.msra.mxu0 %v4292_v40 }
0x1183   :  { %4294 = vmatprep.subr.bf16.mxu0 %v4423_v1 }
0x1250   :  { %v3329_v30 = vpop.f32.mrb[28].mxu0 }
0x1251   :  { %v3330_v31 = vadd.f32 %v3329_v30, %v3257_v29  ;;  %v4136_v32 = vpop.f32.mrb[29].mxu0 }
0x1253   :  { %4385 = vtanh.f32 %v3330_v31  ;;  %v3683_v33 = vmul.f32 -1.442695, %v3330_v31 }
0x1255   :  { %4387 = vpow2.f32 %v3683_v33 }
0x125d   :  { %v4386_v22 = vpop.eup %4385 }
0x125e   :  { %3341 = vrot.lane.b32.xlu0 %v4386_v22, %s4419_s24 }
0x125f   :  { %v4388_v61 = vpop.eup %4387 }
0x1260   :  { %v3336_v34 = vadd.f32 1.0, %v4388_v61 }
0x1262   :  { %4389 = vrcp.f32 %v3336_v34 }
0x126c   :  { %v4390_v35 = vpop.eup %4389 }
0x12d0   :  { %v3342_v36 = vpop.permute.xlu0 %3341 }
0x12d1   :  { %v3344_v0 = vmul.f32 %v4390_v35, %v3342_v36 }
0x12d3   :  { %4391 = vtanh.f32 %v3344_v0 }
0x12dd   :  { %v4392_v41 = vpop.eup %4391 }
0x12de   :  { %3347 = vrot.lane.b32.xlu1 %v4392_v41, %s4424_s27 }
0x1350   :  { %v3348_v42 = vpop.permute.xlu1 %3347 }
0x1351   :  { %v3350_v12 = vmul.f32 %v4390_v35, %v3348_v42 }
0x1353   :  { %3357 = vrot.lane.b32.xlu0 %v3350_v12, %s4422_s26 }
0x13c5   :  { %v3358_v5 = vpop.permute.xlu0 %3357 }
0x13c6   :  { %4146 = vmatmul.mubr.msk.f32.vlgmr.msra.gmra.mrb[30].mxu0 %vm580_vm3, %v3358_v5 }
0x13c7   :  { %4296 = vmatpush3.bf16.msra.mxu0 %v4295_v45  ;;  %4156 = vmatprep.mubr.msk.f32.mxu0 %vm4418_vm6, %v4417_v3 }
0x13c8   :  { %4297 = vmatprep.subr.bf16.mxu0 %v4423_v1 }
0x13cb   :  { %4299 = vmatpush3.bf16.msra.mxu0 %v4298_v48 }
0x13cc   :  { %4300 = vmatprep.subr.bf16.mxu0 %v4423_v1  ;;  %v3513_v1 = vld [vmem:[%s5125_s2 + $0x5d0] sm:$0xff] }
0x13cd   :  { %v4301_v55 = vpack.c.bf16 %v3513_v1, %v3512_v54 }
0x1499   :  { %v3427_v50 = vpop.f32.mrb[30].mxu0 }
0x149a   :  { %v3428_v51 = vadd.f32 %v3427_v50, %v3355_v49  ;;  %v4147_v52 = vpop.f32.mrb[31].mxu0 }
0x149c   :  { %v3432_v53 = vadd.f32 %v3428_v51, %v3358_v5 }
0x149e   :  { %4157 = vmatmul.mubr.msk.f32.vlgmr.msra.gmra.mrb[32].mxu0 %vm580_vm3, %v3432_v53 }
0x149f   :  { %4163 = vmatprep.mubr.msk.f32.mxu0 %vm4418_vm6, %v4417_v3  ;;  %4302 = vmatpush3.bf16.msra.mxu0 %v4301_v55  ;;  %v3514_v3 = vld [vmem:[%s5125_s2 + $0x5e0] ss:$0 sm:$0xff] }
0x1571   :  { %v3507_v57 = vpop.f32.mrb[32].mxu0 }
0x1572   :  { %v3508_v58 = vadd.f32 %v3507_v57, %v3437_v56  ;;  %v4158_v59 = vpop.f32.mrb[33].mxu0 }
0x1574   :  { %v3511_v60 = vmax.f32 %v3508_v58, 0.0 }
0x1576   :  { %4164 = vmatmul.mubr.msk.f32.vlgmr.msra.gmra.mrb[34].mxu0 %vm1163_vm7, %v3511_v60 }
0x1649   :  { %v3584_v62 = vpop.f32.mrb[34].mxu0 }
0x164a   :  { %v3585_v2 = vadd.f32 %v3584_v62, %v3514_v3  ;;  %v4165_v4 = vpop.f32.mrb[35].mxu0 }
0x164c   :  { %3588 = vst [vmem:[#allocation6] sm:$0x3] %v3585_v2 }
0x164d   :  { %4404 = shalt.err (!%p4401_p4)
}
0x164e   :  { %s4405_s0 = scalar_lea.hbm %s5126_s3, 32 }
0x164f   :  { %p4406_p5 = scmp.ne.s32.totalorder %s5126_s3, %s4405_s0  ;;  %p4409_p6 = scmp.lt.u32.totalorder %s4405_s0, %s5126_s3 }
0x1651   :  { %p4411_p7 = pnand %p4409_p6, %p4406_p5 }
0x1653   :  { %4414 = shalt.err (!%p4411_p7)
}
0x1654   :  { %3598 = dma.vmem_to_hbm [thread:$0]  %s3596_s21, 32, %s5126_s3, [#allocation7]  }
0x1655   :  { %4415 = dma.done.wait [#allocation7], 32  }
0x1656   :  { %4416 = vsyncadd [#allocation7], 4294967264 }
0x1657   :  { %3602 = vsyncpa [#allocation7], 1 }

</bundles_post_ra>
